<compile_context>
chip_gen: v5e
topology: v5e:2x2
jax: 0.10.0
libtpu: 0.0.40
codegen_flags: <defaults>
</compile_context>

<pallas_src>
import numpy as np
import jax
import jax.numpy as jnp
from jax.experimental import pallas as pl
from jax.experimental.pallas import tpu as pltpu

# ---------------- synthetic config (small shapes) ----------------
B       = 2      # batch
N_IN    = 1      # config.n_input  (audio channels)
N_TIME  = 128    # waveform length
N_OUT   = 4      # config.n_output (classes)
FE_CH   = 8      # fe1.n_channel == fe2.n_channel (must match for the concat)
FE1_K   = 17     # fe1.kernel_size
FE2_K   = 17     # fe2.kernel_size
SEQ_H   = 16     # seq.n_channel (LSTM hidden size)
CLS_HID = 32     # cls.n_hidden_dim
LANES   = 128
# TODO(synk): fe*.n_block fixed to 1; norm_type / residual_connection_type /
#             learnable bands+windows of FeBlocks not modeled (fixed windowed-sinc FIR).
# TODO(synk): Seq2OneBlocks modeled as a unidirectional LSTM with "last hidden"
#             pooling; bidirectional / use_context variants not modeled.
# TODO(synk): Classifier dropout is a no-op (eval mode).
# TODO(synk): rearrange 'b c n -> b 1 (n c)' implemented for n_input == 1 only
#             (flatten is identity); channel interleaving for n_input > 1 not modeled.


# ---------------- parameter slab layout (one lane-dense DMA) ----------------
def _align8(n):
    return (n + 7) // 8 * 8

_PARAM_SHAPES = [
    ("wf1",  (N_TIME, FE_CH)),        # folded fe1 filters (mask & 1/N applied)
    ("wf2a", (N_TIME, FE_CH)),        # folded fe2 filters, part acting on the raw signal
    ("wf2b", (FE_CH, FE_CH)),         # folded fe2 filters, part acting on x1
    ("wih",  (2, 4 * SEQ_H)),         # stacked LSTM input weights, gate order [i|f|g|o]
    ("whh",  (SEQ_H, 4 * SEQ_H)),     # stacked LSTM recurrent weights
    ("bl",   (1, 4 * SEQ_H)),         # combined LSTM bias (b_ih + b_hh)
    ("w1",   (SEQ_H, CLS_HID)),       # classifier layer 1
    ("b1",   (1, CLS_HID)),
    ("w2",   (CLS_HID, N_OUT)),       # classifier layer 2
    ("b2",   (1, N_OUT)),
]
_LAYOUT = {}
_off = 0
for _name, (_rows, _cols) in _PARAM_SHAPES:
    _LAYOUT[_name] = (_off, _rows, _cols)
    _off = _align8(_off + _rows)
SLAB_ROWS = _off                                   # 360 rows x 128 lanes x f32 ~ 180 KiB


def _param(p_ref, name):
    """Static slice of the packed parameter slab (zero runtime cost)."""
    off, rows, cols = _LAYOUT[name]
    return p_ref[off:off + rows, 0:cols]


# ---------------- fused forward kernel ----------------
def _m24_kernel(x_ref, p_ref, o_ref):
    """Entire M24 forward for one batch block in one invocation.

    x_ref : (Bb, 1, N)       waveform, channels-first
    p_ref : (SLAB_ROWS, 128) packed parameter slab
    o_ref : (Bb, N_OUT)      logits
    """
    Bx = x_ref.shape[0]
    N = x_ref.shape[2]
    H = SEQ_H
    T = FE_CH

    x = x_ref[...].reshape(Bx, N)                                  # (B, N), Ci == 1

    # ---- fe1 / fe2: 'same' FIR conv + mean over time, folded into the weights
    wf1 = _param(p_ref, "wf1")                                     # (N, C)
    wf2a = _param(p_ref, "wf2a")                                   # (N, C)
    wf2b = _param(p_ref, "wf2b")                                   # (C, C)
    x1 = jnp.dot(x, wf1, preferred_element_type=jnp.float32)      # (B, C)
    x2 = (jnp.dot(x, wf2a, preferred_element_type=jnp.float32)
          + jnp.dot(x1, wf2b, preferred_element_type=jnp.float32))  # (B, C)

    # ---- Seq2One: LSTM over seq-len C with 2 features (x1[:,t], x2[:,t]); last hidden
    wih = _param(p_ref, "wih")                                     # (2, 4H)
    whh = _param(p_ref, "whh")                                     # (H, 4H)
    bl = _param(p_ref, "bl")                                       # (1, 4H)

    # input projection hoisted off the serial recurrence and vectorized over T
    xw_all = (x1[:, :, None] * wih[0:1, :][None, :, :]
              + x2[:, :, None] * wih[1:2, :][None, :, :]
              + bl[None, :, :])                                    # (B, T, 4H)

    h = jnp.zeros((Bx, H), jnp.float32)
    c = jnp.zeros((Bx, H), jnp.float32)
    for t in range(T):                                             # static unroll, T == 8
        g = xw_all[:, t, :] + jnp.dot(h, whh,
                                      preferred_element_type=jnp.float32)   # (B, 4H)
        sg = jax.nn.sigmoid(g)                                     # one EUP push: i, f, o
        tg = jnp.tanh(g)                                           # one EUP push: g
        i_g = sg[:, 0:H]
        f_g = sg[:, H:2 * H]
        o_g = sg[:, 3 * H:4 * H]
        g_g = tg[:, 2 * H:3 * H]
        c = f_g * c + i_g * g_g
        h = o_g * jnp.tanh(c)

    # ---- classifier head: Linear -> ReLU -> Linear (dropout is eval no-op)
    w1 = _param(p_ref, "w1")
    b1 = _param(p_ref, "b1")
    w2 = _param(p_ref, "w2")
    b2 = _param(p_ref, "b2")
    hh = jnp.maximum(jnp.dot(h, w1, preferred_element_type=jnp.float32) + b1, 0.0)
    o_ref[...] = (jnp.dot(hh, w2, preferred_element_type=jnp.float32)
                  + b2).astype(o_ref.dtype)


# ---------------- wrapper ----------------
def _cost_estimate(bx):
    h4 = 4 * SEQ_H
    flops = (2 * bx * N_TIME * FE_CH * 2            # x@Wf1, x@Wf2a
             + 2 * bx * FE_CH * FE_CH               # x1@Wf2b
             + 4 * bx * FE_CH * h4                  # vectorized input projection
             + FE_CH * (2 * bx * SEQ_H * h4 + 10 * bx * SEQ_H)   # recurrence
             + 2 * bx * SEQ_H * CLS_HID
             + 2 * bx * CLS_HID * N_OUT)
    transcendentals = FE_CH * (2 * bx * h4 + bx * SEQ_H)
    bytes_accessed = 4 * (bx * N_IN * N_TIME + SLAB_ROWS * LANES + bx * N_OUT)
    return pl.CostEstimate(flops=flops, transcendentals=transcendentals,
                           bytes_accessed=bytes_accessed)


def m24_forward(x, param_slab, *, batch_block=256):
    Bx = x.shape[0]
    cost = _cost_estimate(Bx)

    if Bx >= 2 * batch_block and Bx % batch_block == 0:
        # Production path: tile the batch; the weight slab's index_map always returns
        # block (0, 0) so it stays VMEM-resident across grid steps; 'parallel' lets
        # v7x split batch blocks across its two TensorCores.
        return pl.pallas_call(
            _m24_kernel,
            out_shape=jax.ShapeDtypeStruct((Bx, N_OUT), jnp.float32),
            grid=(Bx // batch_block,),
            in_specs=[pl.BlockSpec((batch_block, N_IN, N_TIME), lambda i: (i, 0, 0)),
                      pl.BlockSpec((SLAB_ROWS, LANES), lambda i: (0, 0))],
            out_specs=pl.BlockSpec((batch_block, N_OUT), lambda i: (i, 0)),
            compiler_params=pltpu.CompilerParams(dimension_semantics=("parallel",)),
            cost_estimate=cost,
        )(x, param_slab)

    # Toy / small-batch path: grid-less, whole working set (~180 KiB) in VMEM.
    return pl.pallas_call(
        _m24_kernel,
        out_shape=jax.ShapeDtypeStruct((Bx, N_OUT), jnp.float32),
        in_specs=[pl.BlockSpec(memory_space=pltpu.MemorySpace.VMEM),
                  pl.BlockSpec(memory_space=pltpu.MemorySpace.VMEM)],
        out_specs=pl.BlockSpec(memory_space=pltpu.MemorySpace.VMEM),
        cost_estimate=cost,
    )(x, param_slab)


# ---------------- deterministic parameter construction (host side) ----------------
def make_sinc_filters(n_filters, kernel_size):
    """Windowed-sinc band-pass filter bank, shaped (K, Co)."""
    m = (kernel_size - 1) / 2.0
    t = np.arange(kernel_size, dtype=np.float64) - m
    win = 0.54 - 0.46 * np.cos(2 * np.pi * np.arange(kernel_size) / (kernel_size - 1))
    filt = np.zeros((kernel_size, n_filters), np.float64)
    for co in range(n_filters):
        f1 = 0.02 + 0.05 * co
        f2 = min(f1 + 0.06, 0.49)
        bp = 2 * f2 * np.sinc(2 * f2 * t) - 2 * f1 * np.sinc(2 * f1 * t)
        filt[:, co] = bp * win
    return filt


def _window_mask(n, k):
    """M[m, j] = 1 iff sample m contributes to window j of the zero-padded 'same'
    conv sum; S = x @ M reproduces the per-offset windowed sums exactly."""
    pad_l = (k - 1) // 2
    mask = np.zeros((n, k), np.float64)
    for j in range(k):
        off = j - pad_l
        lo = max(0, off)
        hi = min(n, n + off)
        mask[lo:hi, j] = 1.0
    return mask


def make_param_slab():
    # Fold window-membership mask AND the 1/N mean into the sinc filter weights.
    w_fe1 = make_sinc_filters(FE_CH, FE1_K)                        # (K1, C)
    w_fe2 = make_sinc_filters(FE_CH, FE2_K)                        # (K2, C)
    n2 = N_TIME + FE_CH
    wf1 = _window_mask(N_TIME, FE1_K) @ w_fe1 / N_TIME             # (N, C)
    wf2 = _window_mask(n2, FE2_K) @ w_fe2 / n2                     # (N + C, C)
    wf2a, wf2b = wf2[:N_TIME], wf2[N_TIME:]

    keys = jax.random.split(jax.random.PRNGKey(1234), 7)

    def rnd(key, shape, scale):
        return scale * np.asarray(jax.random.normal(key, shape, jnp.float32))

    params = {
        "wf1": wf1.astype(np.float32),
        "wf2a": wf2a.astype(np.float32),
        "wf2b": wf2b.astype(np.float32),
        # stacked LSTM weights, gate column order [i | f | g | o] (PyTorch convention)
        "wih": rnd(keys[0], (2, 4 * SEQ_H), 0.30),
        "whh": rnd(keys[1], (SEQ_H, 4 * SEQ_H), 0.30),
        "bl": rnd(keys[2], (1, 4 * SEQ_H), 0.10),
        "w1": rnd(keys[3], (SEQ_H, CLS_HID), 0.20),
        "b1": rnd(keys[4], (1, CLS_HID), 0.05),
        "w2": rnd(keys[5], (CLS_HID, N_OUT), 0.20),
        "b2": rnd(keys[6], (1, N_OUT), 0.05),
    }

    slab = np.zeros((SLAB_ROWS, LANES), np.float32)
    for name, (off, rows, cols) in _LAYOUT.items():
        arr = params[name]
        assert arr.shape == (rows, cols), (name, arr.shape, (rows, cols))
        slab[off:off + rows, :cols] = arr
    return jnp.asarray(slab)


if __name__ == "__main__":
    x = jax.random.normal(jax.random.PRNGKey(0), (B, N_IN, N_TIME), jnp.float32)
    param_slab = make_param_slab()

    fwd = jax.jit(m24_forward)
    logits = fwd(x, param_slab)
    jax.block_until_ready(logits)

    assert logits.shape == (B, N_OUT), logits.shape
    assert bool(jnp.all(jnp.isfinite(logits)))
    print("KERNEL_OK")
</pallas_src>

<mosaic_0001>
module attributes {stable_mosaic.version = 11 : i64} {
  func.func @_m24_kernel(%arg0: memref<2x1x128xf32, #tpu.memory_space<vmem>>, %arg1: memref<360x128xf32, #tpu.memory_space<vmem>>, %arg2: memref<2x4xf32, #tpu.memory_space<vmem>>) attributes {dimension_semantics = [], scalar_prefetch = 0 : i64, scratch_operands = 0 : i64, tpu.core_type = #tpu.core_type<tc>} {
    %c0 = arith.constant 0 : index
    %c0_0 = arith.constant 0 : index
    %c0_1 = arith.constant 0 : index
    %0 = vector.load %arg0[%c0, %c0_0, %c0_1] : memref<2x1x128xf32, #tpu.memory_space<vmem>>, vector<2x1x128xf32>
    %1 = vector.shape_cast %0 : vector<2x1x128xf32> to vector<2x128xf32>
    %c0_2 = arith.constant 0 : index
    %c0_3 = arith.constant 0 : index
    %2 = vector.load %arg1[%c0_2, %c0_3] : memref<360x128xf32, #tpu.memory_space<vmem>>, vector<128x8xf32>
    %c128 = arith.constant 128 : index
    %c0_4 = arith.constant 0 : index
    %3 = vector.load %arg1[%c128, %c0_4] : memref<360x128xf32, #tpu.memory_space<vmem>>, vector<128x8xf32>
    %c256 = arith.constant 256 : index
    %c0_5 = arith.constant 0 : index
    %4 = vector.load %arg1[%c256, %c0_5] : memref<360x128xf32, #tpu.memory_space<vmem>>, vector<8x8xf32>
    %cst = arith.constant dense<0.000000e+00> : vector<2x8xf32>
    %5 = tpu.matmul %1, %2, %cst {dimension_numbers = #tpu.dot_dimension_numbers<[1], [0], [0], [1], [0, 0, 1, 1], [], []>} : vector<2x128xf32>, vector<128x8xf32>, vector<2x8xf32> -> vector<2x8xf32>
    %cst_6 = arith.constant dense<0.000000e+00> : vector<2x8xf32>
    %6 = tpu.matmul %1, %3, %cst_6 {dimension_numbers = #tpu.dot_dimension_numbers<[1], [0], [0], [1], [0, 0, 1, 1], [], []>} : vector<2x128xf32>, vector<128x8xf32>, vector<2x8xf32> -> vector<2x8xf32>
    %cst_7 = arith.constant dense<0.000000e+00> : vector<2x8xf32>
    %7 = tpu.matmul %5, %4, %cst_7 {dimension_numbers = #tpu.dot_dimension_numbers<[1], [0], [0], [1], [0, 0, 1, 1], [], []>} : vector<2x8xf32>, vector<8x8xf32>, vector<2x8xf32> -> vector<2x8xf32>
    %8 = arith.addf %6, %7 : vector<2x8xf32>
    %c264 = arith.constant 264 : index
    %c0_8 = arith.constant 0 : index
    %9 = vector.load %arg1[%c264, %c0_8] : memref<360x128xf32, #tpu.memory_space<vmem>>, vector<2x64xf32>
    %c272 = arith.constant 272 : index
    %c0_9 = arith.constant 0 : index
    %10 = vector.load %arg1[%c272, %c0_9] : memref<360x128xf32, #tpu.memory_space<vmem>>, vector<16x64xf32>
    %c288 = arith.constant 288 : index
    %c0_10 = arith.constant 0 : index
    %11 = vector.load %arg1[%c288, %c0_10] : memref<360x128xf32, #tpu.memory_space<vmem>>, vector<1x64xf32>
    %12 = vector.shape_cast %5 : vector<2x8xf32> to vector<2x8x1xf32>
    %13 = vector.extract_strided_slice %9 {offsets = [0, 0], sizes = [1, 64], strides = [1, 1]} : vector<2x64xf32> to vector<1x64xf32>
    %14 = vector.shape_cast %13 : vector<1x64xf32> to vector<1x1x64xf32>
    %15 = vector.broadcast %12 : vector<2x8x1xf32> to vector<2x8x64xf32>
    %16 = vector.broadcast %14 : vector<1x1x64xf32> to vector<2x8x64xf32>
    %17 = arith.mulf %15, %16 : vector<2x8x64xf32>
    %18 = vector.shape_cast %8 : vector<2x8xf32> to vector<2x8x1xf32>
    %19 = vector.extract_strided_slice %9 {offsets = [1, 0], sizes = [1, 64], strides = [1, 1]} : vector<2x64xf32> to vector<1x64xf32>
    %20 = vector.shape_cast %19 : vector<1x64xf32> to vector<1x1x64xf32>
    %21 = vector.broadcast %18 : vector<2x8x1xf32> to vector<2x8x64xf32>
    %22 = vector.broadcast %20 : vector<1x1x64xf32> to vector<2x8x64xf32>
    %23 = arith.mulf %21, %22 : vector<2x8x64xf32>
    %24 = arith.addf %17, %23 : vector<2x8x64xf32>
    %25 = vector.shape_cast %11 : vector<1x64xf32> to vector<1x1x64xf32>
    %26 = vector.broadcast %25 : vector<1x1x64xf32> to vector<2x8x64xf32>
    %27 = arith.addf %24, %26 : vector<2x8x64xf32>
    %cst_11 = arith.constant 0.000000e+00 : f32
    %28 = vector.broadcast %cst_11 : f32 to vector<2x16xf32>
    %cst_12 = arith.constant 0.000000e+00 : f32
    %29 = vector.broadcast %cst_12 : f32 to vector<2x16xf32>
    %30 = vector.extract_strided_slice %27 {offsets = [0, 0, 0], sizes = [2, 1, 64], strides = [1, 1, 1]} : vector<2x8x64xf32> to vector<2x1x64xf32>
    %31 = vector.shape_cast %30 : vector<2x1x64xf32> to vector<2x64xf32>
    %cst_13 = arith.constant dense<0.000000e+00> : vector<2x64xf32>
    %32 = tpu.matmul %28, %10, %cst_13 {dimension_numbers = #tpu.dot_dimension_numbers<[1], [0], [0], [1], [0, 0, 1, 1], [], []>} : vector<2x16xf32>, vector<16x64xf32>, vector<2x64xf32> -> vector<2x64xf32>
    %33 = arith.addf %31, %32 : vector<2x64xf32>
    %34 = arith.negf %33 : vector<2x64xf32>
    %35 = math.exp %34 : vector<2x64xf32>
    %cst_14 = arith.constant 1.000000e+00 : f32
    %36 = vector.broadcast %cst_14 : f32 to vector<2x64xf32>
    %37 = arith.addf %36, %35 : vector<2x64xf32>
    %38 = arith.divf %36, %37 : vector<2x64xf32>
    %39 = math.tanh %33 : vector<2x64xf32>
    %40 = vector.extract_strided_slice %38 {offsets = [0, 0], sizes = [2, 16], strides = [1, 1]} : vector<2x64xf32> to vector<2x16xf32>
    %41 = vector.extract_strided_slice %38 {offsets = [0, 16], sizes = [2, 16], strides = [1, 1]} : vector<2x64xf32> to vector<2x16xf32>
    %42 = vector.extract_strided_slice %38 {offsets = [0, 48], sizes = [2, 16], strides = [1, 1]} : vector<2x64xf32> to vector<2x16xf32>
    %43 = vector.extract_strided_slice %39 {offsets = [0, 32], sizes = [2, 16], strides = [1, 1]} : vector<2x64xf32> to vector<2x16xf32>
    %44 = arith.mulf %41, %29 : vector<2x16xf32>
    %45 = arith.mulf %40, %43 : vector<2x16xf32>
    %46 = arith.addf %44, %45 : vector<2x16xf32>
    %47 = math.tanh %46 : vector<2x16xf32>
    %48 = arith.mulf %42, %47 : vector<2x16xf32>
    %49 = vector.extract_strided_slice %27 {offsets = [0, 1, 0], sizes = [2, 1, 64], strides = [1, 1, 1]} : vector<2x8x64xf32> to vector<2x1x64xf32>
    %50 = vector.shape_cast %49 : vector<2x1x64xf32> to vector<2x64xf32>
    %cst_15 = arith.constant dense<0.000000e+00> : vector<2x64xf32>
    %51 = tpu.matmul %48, %10, %cst_15 {dimension_numbers = #tpu.dot_dimension_numbers<[1], [0], [0], [1], [0, 0, 1, 1], [], []>} : vector<2x16xf32>, vector<16x64xf32>, vector<2x64xf32> -> vector<2x64xf32>
    %52 = arith.addf %50, %51 : vector<2x64xf32>
    %53 = arith.negf %52 : vector<2x64xf32>
    %54 = math.exp %53 : vector<2x64xf32>
    %cst_16 = arith.constant 1.000000e+00 : f32
    %55 = vector.broadcast %cst_16 : f32 to vector<2x64xf32>
    %56 = arith.addf %55, %54 : vector<2x64xf32>
    %57 = arith.divf %55, %56 : vector<2x64xf32>
    %58 = math.tanh %52 : vector<2x64xf32>
    %59 = vector.extract_strided_slice %57 {offsets = [0, 0], sizes = [2, 16], strides = [1, 1]} : vector<2x64xf32> to vector<2x16xf32>
    %60 = vector.extract_strided_slice %57 {offsets = [0, 16], sizes = [2, 16], strides = [1, 1]} : vector<2x64xf32> to vector<2x16xf32>
    %61 = vector.extract_strided_slice %57 {offsets = [0, 48], sizes = [2, 16], strides = [1, 1]} : vector<2x64xf32> to vector<2x16xf32>
    %62 = vector.extract_strided_slice %58 {offsets = [0, 32], sizes = [2, 16], strides = [1, 1]} : vector<2x64xf32> to vector<2x16xf32>
    %63 = arith.mulf %60, %46 : vector<2x16xf32>
    %64 = arith.mulf %59, %62 : vector<2x16xf32>
    %65 = arith.addf %63, %64 : vector<2x16xf32>
    %66 = math.tanh %65 : vector<2x16xf32>
    %67 = arith.mulf %61, %66 : vector<2x16xf32>
    %68 = vector.extract_strided_slice %27 {offsets = [0, 2, 0], sizes = [2, 1, 64], strides = [1, 1, 1]} : vector<2x8x64xf32> to vector<2x1x64xf32>
    %69 = vector.shape_cast %68 : vector<2x1x64xf32> to vector<2x64xf32>
    %cst_17 = arith.constant dense<0.000000e+00> : vector<2x64xf32>
    %70 = tpu.matmul %67, %10, %cst_17 {dimension_numbers = #tpu.dot_dimension_numbers<[1], [0], [0], [1], [0, 0, 1, 1], [], []>} : vector<2x16xf32>, vector<16x64xf32>, vector<2x64xf32> -> vector<2x64xf32>
    %71 = arith.addf %69, %70 : vector<2x64xf32>
    %72 = arith.negf %71 : vector<2x64xf32>
    %73 = math.exp %72 : vector<2x64xf32>
    %cst_18 = arith.constant 1.000000e+00 : f32
    %74 = vector.broadcast %cst_18 : f32 to vector<2x64xf32>
    %75 = arith.addf %74, %73 : vector<2x64xf32>
    %76 = arith.divf %74, %75 : vector<2x64xf32>
    %77 = math.tanh %71 : vector<2x64xf32>
    %78 = vector.extract_strided_slice %76 {offsets = [0, 0], sizes = [2, 16], strides = [1, 1]} : vector<2x64xf32> to vector<2x16xf32>
    %79 = vector.extract_strided_slice %76 {offsets = [0, 16], sizes = [2, 16], strides = [1, 1]} : vector<2x64xf32> to vector<2x16xf32>
    %80 = vector.extract_strided_slice %76 {offsets = [0, 48], sizes = [2, 16], strides = [1, 1]} : vector<2x64xf32> to vector<2x16xf32>
    %81 = vector.extract_strided_slice %77 {offsets = [0, 32], sizes = [2, 16], strides = [1, 1]} : vector<2x64xf32> to vector<2x16xf32>
    %82 = arith.mulf %79, %65 : vector<2x16xf32>
    %83 = arith.mulf %78, %81 : vector<2x16xf32>
    %84 = arith.addf %82, %83 : vector<2x16xf32>
    %85 = math.tanh %84 : vector<2x16xf32>
    %86 = arith.mulf %80, %85 : vector<2x16xf32>
    %87 = vector.extract_strided_slice %27 {offsets = [0, 3, 0], sizes = [2, 1, 64], strides = [1, 1, 1]} : vector<2x8x64xf32> to vector<2x1x64xf32>
    %88 = vector.shape_cast %87 : vector<2x1x64xf32> to vector<2x64xf32>
    %cst_19 = arith.constant dense<0.000000e+00> : vector<2x64xf32>
    %89 = tpu.matmul %86, %10, %cst_19 {dimension_numbers = #tpu.dot_dimension_numbers<[1], [0], [0], [1], [0, 0, 1, 1], [], []>} : vector<2x16xf32>, vector<16x64xf32>, vector<2x64xf32> -> vector<2x64xf32>
    %90 = arith.addf %88, %89 : vector<2x64xf32>
    %91 = arith.negf %90 : vector<2x64xf32>
    %92 = math.exp %91 : vector<2x64xf32>
    %cst_20 = arith.constant 1.000000e+00 : f32
    %93 = vector.broadcast %cst_20 : f32 to vector<2x64xf32>
    %94 = arith.addf %93, %92 : vector<2x64xf32>
    %95 = arith.divf %93, %94 : vector<2x64xf32>
    %96 = math.tanh %90 : vector<2x64xf32>
    %97 = vector.extract_strided_slice %95 {offsets = [0, 0], sizes = [2, 16], strides = [1, 1]} : vector<2x64xf32> to vector<2x16xf32>
    %98 = vector.extract_strided_slice %95 {offsets = [0, 16], sizes = [2, 16], strides = [1, 1]} : vector<2x64xf32> to vector<2x16xf32>
    %99 = vector.extract_strided_slice %95 {offsets = [0, 48], sizes = [2, 16], strides = [1, 1]} : vector<2x64xf32> to vector<2x16xf32>
    %100 = vector.extract_strided_slice %96 {offsets = [0, 32], sizes = [2, 16], strides = [1, 1]} : vector<2x64xf32> to vector<2x16xf32>
    %101 = arith.mulf %98, %84 : vector<2x16xf32>
    %102 = arith.mulf %97, %100 : vector<2x16xf32>
    %103 = arith.addf %101, %102 : vector<2x16xf32>
    %104 = math.tanh %103 : vector<2x16xf32>
    %105 = arith.mulf %99, %104 : vector<2x16xf32>
    %106 = vector.extract_strided_slice %27 {offsets = [0, 4, 0], sizes = [2, 1, 64], strides = [1, 1, 1]} : vector<2x8x64xf32> to vector<2x1x64xf32>
    %107 = vector.shape_cast %106 : vector<2x1x64xf32> to vector<2x64xf32>
    %cst_21 = arith.constant dense<0.000000e+00> : vector<2x64xf32>
    %108 = tpu.matmul %105, %10, %cst_21 {dimension_numbers = #tpu.dot_dimension_numbers<[1], [0], [0], [1], [0, 0, 1, 1], [], []>} : vector<2x16xf32>, vector<16x64xf32>, vector<2x64xf32> -> vector<2x64xf32>
    %109 = arith.addf %107, %108 : vector<2x64xf32>
    %110 = arith.negf %109 : vector<2x64xf32>
    %111 = math.exp %110 : vector<2x64xf32>
    %cst_22 = arith.constant 1.000000e+00 : f32
    %112 = vector.broadcast %cst_22 : f32 to vector<2x64xf32>
    %113 = arith.addf %112, %111 : vector<2x64xf32>
    %114 = arith.divf %112, %113 : vector<2x64xf32>
    %115 = math.tanh %109 : vector<2x64xf32>
    %116 = vector.extract_strided_slice %114 {offsets = [0, 0], sizes = [2, 16], strides = [1, 1]} : vector<2x64xf32> to vector<2x16xf32>
    %117 = vector.extract_strided_slice %114 {offsets = [0, 16], sizes = [2, 16], strides = [1, 1]} : vector<2x64xf32> to vector<2x16xf32>
    %118 = vector.extract_strided_slice %114 {offsets = [0, 48], sizes = [2, 16], strides = [1, 1]} : vector<2x64xf32> to vector<2x16xf32>
    %119 = vector.extract_strided_slice %115 {offsets = [0, 32], sizes = [2, 16], strides = [1, 1]} : vector<2x64xf32> to vector<2x16xf32>
    %120 = arith.mulf %117, %103 : vector<2x16xf32>
    %121 = arith.mulf %116, %119 : vector<2x16xf32>
    %122 = arith.addf %120, %121 : vector<2x16xf32>
    %123 = math.tanh %122 : vector<2x16xf32>
    %124 = arith.mulf %118, %123 : vector<2x16xf32>
    %125 = vector.extract_strided_slice %27 {offsets = [0, 5, 0], sizes = [2, 1, 64], strides = [1, 1, 1]} : vector<2x8x64xf32> to vector<2x1x64xf32>
    %126 = vector.shape_cast %125 : vector<2x1x64xf32> to vector<2x64xf32>
    %cst_23 = arith.constant dense<0.000000e+00> : vector<2x64xf32>
    %127 = tpu.matmul %124, %10, %cst_23 {dimension_numbers = #tpu.dot_dimension_numbers<[1], [0], [0], [1], [0, 0, 1, 1], [], []>} : vector<2x16xf32>, vector<16x64xf32>, vector<2x64xf32> -> vector<2x64xf32>
    %128 = arith.addf %126, %127 : vector<2x64xf32>
    %129 = arith.negf %128 : vector<2x64xf32>
    %130 = math.exp %129 : vector<2x64xf32>
    %cst_24 = arith.constant 1.000000e+00 : f32
    %131 = vector.broadcast %cst_24 : f32 to vector<2x64xf32>
    %132 = arith.addf %131, %130 : vector<2x64xf32>
    %133 = arith.divf %131, %132 : vector<2x64xf32>
    %134 = math.tanh %128 : vector<2x64xf32>
    %135 = vector.extract_strided_slice %133 {offsets = [0, 0], sizes = [2, 16], strides = [1, 1]} : vector<2x64xf32> to vector<2x16xf32>
    %136 = vector.extract_strided_slice %133 {offsets = [0, 16], sizes = [2, 16], strides = [1, 1]} : vector<2x64xf32> to vector<2x16xf32>
    %137 = vector.extract_strided_slice %133 {offsets = [0, 48], sizes = [2, 16], strides = [1, 1]} : vector<2x64xf32> to vector<2x16xf32>
    %138 = vector.extract_strided_slice %134 {offsets = [0, 32], sizes = [2, 16], strides = [1, 1]} : vector<2x64xf32> to vector<2x16xf32>
    %139 = arith.mulf %136, %122 : vector<2x16xf32>
    %140 = arith.mulf %135, %138 : vector<2x16xf32>
    %141 = arith.addf %139, %140 : vector<2x16xf32>
    %142 = math.tanh %141 : vector<2x16xf32>
    %143 = arith.mulf %137, %142 : vector<2x16xf32>
    %144 = vector.extract_strided_slice %27 {offsets = [0, 6, 0], sizes = [2, 1, 64], strides = [1, 1, 1]} : vector<2x8x64xf32> to vector<2x1x64xf32>
    %145 = vector.shape_cast %144 : vector<2x1x64xf32> to vector<2x64xf32>
    %cst_25 = arith.constant dense<0.000000e+00> : vector<2x64xf32>
    %146 = tpu.matmul %143, %10, %cst_25 {dimension_numbers = #tpu.dot_dimension_numbers<[1], [0], [0], [1], [0, 0, 1, 1], [], []>} : vector<2x16xf32>, vector<16x64xf32>, vector<2x64xf32> -> vector<2x64xf32>
    %147 = arith.addf %145, %146 : vector<2x64xf32>
    %148 = arith.negf %147 : vector<2x64xf32>
    %149 = math.exp %148 : vector<2x64xf32>
    %cst_26 = arith.constant 1.000000e+00 : f32
    %150 = vector.broadcast %cst_26 : f32 to vector<2x64xf32>
    %151 = arith.addf %150, %149 : vector<2x64xf32>
    %152 = arith.divf %150, %151 : vector<2x64xf32>
    %153 = math.tanh %147 : vector<2x64xf32>
    %154 = vector.extract_strided_slice %152 {offsets = [0, 0], sizes = [2, 16], strides = [1, 1]} : vector<2x64xf32> to vector<2x16xf32>
    %155 = vector.extract_strided_slice %152 {offsets = [0, 16], sizes = [2, 16], strides = [1, 1]} : vector<2x64xf32> to vector<2x16xf32>
    %156 = vector.extract_strided_slice %152 {offsets = [0, 48], sizes = [2, 16], strides = [1, 1]} : vector<2x64xf32> to vector<2x16xf32>
    %157 = vector.extract_strided_slice %153 {offsets = [0, 32], sizes = [2, 16], strides = [1, 1]} : vector<2x64xf32> to vector<2x16xf32>
    %158 = arith.mulf %155, %141 : vector<2x16xf32>
    %159 = arith.mulf %154, %157 : vector<2x16xf32>
    %160 = arith.addf %158, %159 : vector<2x16xf32>
    %161 = math.tanh %160 : vector<2x16xf32>
    %162 = arith.mulf %156, %161 : vector<2x16xf32>
    %163 = vector.extract_strided_slice %27 {offsets = [0, 7, 0], sizes = [2, 1, 64], strides = [1, 1, 1]} : vector<2x8x64xf32> to vector<2x1x64xf32>
    %164 = vector.shape_cast %163 : vector<2x1x64xf32> to vector<2x64xf32>
    %cst_27 = arith.constant dense<0.000000e+00> : vector<2x64xf32>
    %165 = tpu.matmul %162, %10, %cst_27 {dimension_numbers = #tpu.dot_dimension_numbers<[1], [0], [0], [1], [0, 0, 1, 1], [], []>} : vector<2x16xf32>, vector<16x64xf32>, vector<2x64xf32> -> vector<2x64xf32>
    %166 = arith.addf %164, %165 : vector<2x64xf32>
    %167 = arith.negf %166 : vector<2x64xf32>
    %168 = math.exp %167 : vector<2x64xf32>
    %cst_28 = arith.constant 1.000000e+00 : f32
    %169 = vector.broadcast %cst_28 : f32 to vector<2x64xf32>
    %170 = arith.addf %169, %168 : vector<2x64xf32>
    %171 = arith.divf %169, %170 : vector<2x64xf32>
    %172 = math.tanh %166 : vector<2x64xf32>
    %173 = vector.extract_strided_slice %171 {offsets = [0, 0], sizes = [2, 16], strides = [1, 1]} : vector<2x64xf32> to vector<2x16xf32>
    %174 = vector.extract_strided_slice %171 {offsets = [0, 16], sizes = [2, 16], strides = [1, 1]} : vector<2x64xf32> to vector<2x16xf32>
    %175 = vector.extract_strided_slice %171 {offsets = [0, 48], sizes = [2, 16], strides = [1, 1]} : vector<2x64xf32> to vector<2x16xf32>
    %176 = vector.extract_strided_slice %172 {offsets = [0, 32], sizes = [2, 16], strides = [1, 1]} : vector<2x64xf32> to vector<2x16xf32>
    %177 = arith.mulf %174, %160 : vector<2x16xf32>
    %178 = arith.mulf %173, %176 : vector<2x16xf32>
    %179 = arith.addf %177, %178 : vector<2x16xf32>
    %180 = math.tanh %179 : vector<2x16xf32>
    %181 = arith.mulf %175, %180 : vector<2x16xf32>
    %c296 = arith.constant 296 : index
    %c0_29 = arith.constant 0 : index
    %182 = vector.load %arg1[%c296, %c0_29] : memref<360x128xf32, #tpu.memory_space<vmem>>, vector<16x32xf32>
    %c312 = arith.constant 312 : index
    %c0_30 = arith.constant 0 : index
    %183 = vector.load %arg1[%c312, %c0_30] : memref<360x128xf32, #tpu.memory_space<vmem>>, vector<1x32xf32>
    %c320 = arith.constant 320 : index
    %c0_31 = arith.constant 0 : index
    %184 = vector.load %arg1[%c320, %c0_31] : memref<360x128xf32, #tpu.memory_space<vmem>>, vector<32x4xf32>
    %c352 = arith.constant 352 : index
    %c0_32 = arith.constant 0 : index
    %185 = vector.load %arg1[%c352, %c0_32] : memref<360x128xf32, #tpu.memory_space<vmem>>, vector<1x4xf32>
    %cst_33 = arith.constant dense<0.000000e+00> : vector<2x32xf32>
    %186 = tpu.matmul %181, %182, %cst_33 {dimension_numbers = #tpu.dot_dimension_numbers<[1], [0], [0], [1], [0, 0, 1, 1], [], []>} : vector<2x16xf32>, vector<16x32xf32>, vector<2x32xf32> -> vector<2x32xf32>
    %187 = vector.broadcast %183 : vector<1x32xf32> to vector<2x32xf32>
    %188 = arith.addf %186, %187 : vector<2x32xf32>
    %cst_34 = arith.constant 0.000000e+00 : f32
    %189 = vector.broadcast %cst_34 : f32 to vector<2x32xf32>
    %190 = arith.maximumf %188, %189 : vector<2x32xf32>
    %cst_35 = arith.constant dense<0.000000e+00> : vector<2x4xf32>
    %191 = tpu.matmul %190, %184, %cst_35 {dimension_numbers = #tpu.dot_dimension_numbers<[1], [0], [0], [1], [0, 0, 1, 1], [], []>} : vector<2x32xf32>, vector<32x4xf32>, vector<2x4xf32> -> vector<2x4xf32>
    %192 = vector.broadcast %185 : vector<1x4xf32> to vector<2x4xf32>
    %193 = arith.addf %191, %192 : vector<2x4xf32>
    %c0_36 = arith.constant 0 : index
    %c0_37 = arith.constant 0 : index
    %194 = vector.load %arg2[%c0_36, %c0_37] : memref<2x4xf32, #tpu.memory_space<vmem>>, vector<2x4xf32>
    tpu.vector_store %arg2[%c0_36, %c0_37], %193 {strides = array<i32>} : memref<2x4xf32, #tpu.memory_space<vmem>>, vector<2x4xf32>,
    return
  }
}

</mosaic_0001>

<bundles_post_ra>
// kernel: m24_forward.1
= control target key start
LH: loop header
LB: loop body
LE: loop exit
PB: predicated region body
PF: predicated region fallthrough
CT: control target
= control target key end

     0   :  { %7 = vsyncpa [#allocation3], 0  ;;  %s1649_s0 = inlined_call_operand.hbm [shape: f32[2,1,128], index: 0, kind: input, shape index: {}]   ;;  %s1650_s1 = inlined_call_operand.hbm [shape: f32[360,128], index: 1, kind: input, shape index: {}]   ;;  %s1651_s2 = inlined_call_operand.hbm [shape: f32[2,4], index: 2, kind: output, shape index: {}]  }
   0x1   :  { %8 = vsyncpa [#allocation6], 0 }
   0x2   :  { %9 = vsyncpa [#allocation4], 0  ;;  %s14_s11 = sshll.u32 %s1649_s0, 4  ;;  %s1444_s12 = smov [#allocation2]   ;;  %s15_s11 = int_to_ptr.hbm [resolvable:$true] %s14_s11 }
   0x3   :  { %s16_s13 = sshll.u32 %s1444_s12, 4  ;;  %s27_s16 = sshll.u32 %s1650_s1, 4  ;;  %s17_s13 = int_to_ptr.vmem [resolvable:$true] %s16_s13  ;;  %s28_s16 = int_to_ptr.hbm [resolvable:$true] %s27_s16 }
   0x4   :  { %s1445_s17 = smov 16   ;;  %s1446_s18 = smov 1  }
   0x5   :  { %22 = dma.hbm_to_vmem [thread:$0]  %s15_s11, 32, %s17_s13, [#allocation3], %s1445_s17, %s1445_s17, %s1446_s18  }
   0x6   :  { %s1447_s19 = smov [#allocation5]   ;;  %s1448_s21 = smov 128  }
   0x7   :  { %s29_s20 = sshll.u32 %s1447_s19, 4  ;;  %s1449_s22 = smov 8   ;;  %s30_s20 = int_to_ptr.vmem [resolvable:$true] %s29_s20 }
   0x8   :  { %35 = dma.hbm_to_vmem [thread:$0]  %s28_s16, 5760, %s30_s20, [#allocation6], %s1448_s21, %s1448_s21, %s1449_s22  }
   0x9   :  { %1438 = dma.done.wait [#allocation3], 32  }
   0xa   :  { %1439 = vsyncadd [#allocation3], 4294967264 }
   0xb   :  { %1440 = dma.done.wait [#allocation6], 5760  }
   0xc   :  { %1441 = vsyncadd [#allocation6], 4294961536  ;;  %v61_v0 = vld [vmem:[#allocation5 + $0x78] sm:$0xff]  ;;  %v60_v1 = vld [vmem:[#allocation5 + $0x70] sm:$0xff]  ;;  %v160_v6 = vlaneseq  ;;  %vm106_vm0 = vcmask 64512   ;;  %v1450_v44 = vmov 0.0  }
   0xd   :  { %86 = vmatpush.msra.mxu0 %v61_v0  ;;  %v59_v2 = vld [vmem:[#allocation5 + $0x68] sm:$0xff]  ;;  %v58_v3 = vld [vmem:[#allocation5 + $0x60] sm:$0xff]  ;;  %v44_v4 = vld [vmem:[#allocation2] sm:$0x1]  ;;  %s1451_s0 = smov 96   ;;  %s1452_s1 = smov 32  }
   0xe   :  { %v45_v5 = vld [vmem:[#allocation2 + $0x1] sm:$0x1]  ;;  %81 = vst [vmem:[#allocation1] ss:$9 sm:$0xff] %v44_v4  ;;  %v76_v9 = vld [vmem:[#allocation5 + $0xf0] sm:$0xff]  ;;  %v161_v10 = vshrl.u32 %v160_v6, 7 }
   0xf   :  { %87 = vmatpush.msra.mxu0 %v60_v1  ;;  %v57_v7 = vld [vmem:[#allocation5 + $0x58] sm:$0xff]  ;;  %83 = vst [vmem:[#allocation1 + $0x1] ss:$9 sm:$0xff] %v45_v5  ;;  %v56_v11 = vld [vmem:[#allocation5 + $0x50] sm:$0xff]  ;;  %v75_v12 = vld [vmem:[#allocation5 + $0xe8] sm:$0xff]  ;;  %vm305_vm9 = vcmask 1041409  }
  0x10   :  { %v77_v8 = vld [vmem:[#allocation5 + $0xf8] sm:$0xff]  ;;  %v55_v13 = vld [vmem:[#allocation5 + $0x48] sm:$0xff]  ;;  %v74_v14 = vld [vmem:[#allocation5 + $0xe0] sm:$0xff]  ;;  %1234 = vset.pattern.permute.xlu1 %v161_v10  ;;  %1233 = vset.pattern.permute.xlu0 %v161_v10  ;;  %s1453_s23 = smov 80   ;;  %vm198_vm10 = vcmask 130048   ;;  %s1454_s24 = smov [#allocation7]  }
  0x11   :  { %88 = vmatpush.msra.mxu0 %v59_v2  ;;  %135 = vmatpush.msra.mxu2 %v77_v8  ;;  %v54_v15 = vld [vmem:[#allocation5 + $0x40] sm:$0xff]  ;;  %v73_v16 = vld [vmem:[#allocation5 + $0xd8] sm:$0xff]  ;;  %v72_v19 = vld [vmem:[#allocation5 + $0xd0] sm:$0xff]  ;;  %s1183_s25 = sshll.u32 %s1454_s24, 4  ;;  %s1185_s28 = sshll.u32 %s1651_s2, 4  ;;  %s1184_s25 = int_to_ptr.vmem [resolvable:$true] %s1183_s25  ;;  %s1186_s28 = int_to_ptr.hbm [resolvable:$true] %s1185_s28 }
  0x12   :  { %v53_v17 = vld [vmem:[#allocation5 + $0x38] sm:$0xff]  ;;  %v52_v20 = vld [vmem:[#allocation5 + $0x30] sm:$0xff]  ;;  %v71_v21 = vld [vmem:[#allocation5 + $0xc8] sm:$0xff] }
  0x13   :  { %89 = vmatpush.msra.mxu0 %v58_v3  ;;  %136 = vmatpush.msra.mxu2 %v76_v9  ;;  %v51_v22 = vld [vmem:[#allocation5 + $0x28] sm:$0xff]  ;;  %v70_v23 = vld [vmem:[#allocation5 + $0xc0] sm:$0xff]  ;;  %v69_v25 = vld [vmem:[#allocation5 + $0xb8] sm:$0xff] }
  0x14   :  { %v50_v24 = vld [vmem:[#allocation5 + $0x20] sm:$0xff]  ;;  %v49_v26 = vld [vmem:[#allocation5 + $0x18] sm:$0xff]  ;;  %v68_v27 = vld [vmem:[#allocation5 + $0xb0] sm:$0xff] }
  0x15   :  { %90 = vmatpush.msra.mxu0 %v57_v7  ;;  %137 = vmatpush.msra.mxu2 %v75_v12  ;;  %v48_v28 = vld [vmem:[#allocation5 + $0x10] sm:$0xff]  ;;  %v67_v29 = vld [vmem:[#allocation5 + $0xa8] sm:$0xff]  ;;  %v66_v31 = vld [vmem:[#allocation5 + $0xa0] sm:$0xff] }
  0x16   :  { %v84_v18 = vld [vmem:[#allocation1] sm:$0xff]  ;;  %v47_v30 = vld [vmem:[#allocation5 + $0x8] sm:$0xff]  ;;  %v46_v32 = vld [vmem:[#allocation5] sm:$0xff] }
  0x17   :  { %91 = vmatpush.msra.mxu0 %v56_v11  ;;  %138 = vmatpush.msra.mxu2 %v74_v14  ;;  %130 = vst [vmem:[#allocation1] ss:$9 sm:$0xff] %v44_v4  ;;  %v65_v33 = vld [vmem:[#allocation5 + $0x98] sm:$0xff]  ;;  %v64_v34 = vld [vmem:[#allocation5 + $0x90] sm:$0xff]  ;;  %v63_v35 = vld [vmem:[#allocation5 + $0x88] sm:$0xff] }
  0x18   :  { %132 = vst [vmem:[#allocation1 + $0x1] ss:$9 sm:$0xff] %v45_v5  ;;  %v62_v36 = vld [vmem:[#allocation5 + $0x80] sm:$0xff]  ;;  %v1478_v39 = vld [vmem:[#allocation5 + $0x118] sm:$0xff]  ;;  %v1480_v40 = vld [vmem:[#allocation5 + $0x110] sm:$0xff] }
  0x19   :  { %92 = vmatpush.msra.mxu0 %v55_v13  ;;  %139 = vmatpush.msra.mxu2 %v73_v16  ;;  %v78_v38 = vld [vmem:[#allocation5 + $0x100] sm:$0xff]  ;;  %v155_v52 = vld [vmem:[#allocation5 + $0x108] sm:$0x3] }
  0x1a   :  { %125 = vmatpush.msra.mxu1 %v78_v38  ;;  %216 = vmatpush.msra.mxu3 %v1478_v39  ;;  %v173_v53 = vperm.slane %v155_v52, 0  ;;  %v190_v54 = vperm.slane %v155_v52, 1  ;;  %v1235_v59 = vld [vmem:[#allocation5 + $0x120] ss:$0 sm:$0xff] }
  0x1b   :  { %93 = vmatpush.msra.mxu0 %v54_v15  ;;  %140 = vmatpush.msra.mxu2 %v72_v19 }
  0x1c   :  { %325 = vmatpush.msrb.mxu1 %v1478_v39  ;;  %217 = vmatpush.msra.mxu3 %v1480_v40 }
  0x1d   :  { %94 = vmatpush.msra.mxu0 %v53_v17  ;;  %141 = vmatpush.msra.mxu2 %v71_v21 }
  0x1e   :  { %326 = vmatpush.msrb.mxu1 %v1480_v40  ;;  %439 = vmatpush.msrb.mxu3 %v1478_v39 }
  0x1f   :  { %95 = vmatpush.msra.mxu0 %v52_v20  ;;  %142 = vmatpush.msra.mxu2 %v70_v23  ;;  %v133_v37 = vld [vmem:[#allocation1] sm:$0xff] }
  0x20   :  { %440 = vmatpush.msrb.mxu3 %v1480_v40 }
  0x21   :  { %96 = vmatpush.msra.mxu0 %v51_v22  ;;  %143 = vmatpush.msra.mxu2 %v69_v25 }
  0x22   :  { %218 = vmatmul.f32.vlgmr.msra.gmra.mxu3 %v1450_v44 }
  0x23   :  { %97 = vmatpush.msra.mxu0 %v50_v24  ;;  %144 = vmatpush.msra.mxu2 %v68_v27 }
  0x24   :  { %671 = vmatpush.msra.mxu3 %v1478_v39 }
  0x25   :  { %98 = vmatpush.msra.mxu0 %v49_v26  ;;  %145 = vmatpush.msra.mxu2 %v67_v29 }
  0x26   :  { %672 = vmatpush.msra.mxu3 %v1480_v40 }
  0x27   :  { %99 = vmatpush.msra.mxu0 %v48_v28  ;;  %146 = vmatpush.msra.mxu2 %v66_v31 }
  0x29   :  { %100 = vmatpush.msra.mxu0 %v47_v30  ;;  %147 = vmatpush.msra.mxu2 %v65_v33 }
  0x2b   :  { %101 = vmatpush.msra.mxu0 %v46_v32  ;;  %148 = vmatpush.msra.mxu2 %v64_v34 }
  0x2c   :  { %102 = vmatmul.f32.vlgmr.msra.gmra.mxu0 %v84_v18 }
  0x2d   :  { %149 = vmatpush.msra.mxu2 %v63_v35 }
  0x2f   :  { %150 = vmatpush.msra.mxu2 %v62_v36 }
  0x30   :  { %151 = vmatmul.f32.vlgmr.msra.gmra.mxu2 %v133_v37 }
  0xa5   :  { %v219_v55 = vpop.f32.mrf.mxu3 }
  0xa6   :  { %v223_v63 = vrot.slane %v219_v55, 1 }
  0xa9   :  { %v103_v41 = vpop.f32.mrf.mxu0 }
  0xaa   :  { %1196 = vmatmul.msk.f32.vlgmr.msra.gmra.mxu1 %vm106_vm0, %v103_v41  ;;  %v166_v42 = vperm.slane %v103_v41, 1  ;;  %v159_v43 = vperm.slane %v103_v41, 0 }
  0xab   :  { %555 = vmatpush.msra.mxu1 %v1478_v39 }
  0xac   :  { %171 = vperm.xlu0 %1233, %v166_v42   ;;  %164 = vperm.xlu1 %1234, %v159_v43  }
  0xad   :  { %556 = vmatpush.msra.mxu1 %v1480_v40 }
  0xb3   :  { %v152_v45 = vpop.f32.mrf.mxu2 }
 0x11e   :  { %v172_v50 = vpop.permute.xlu0 %171  ;;  %v165_v51 = vpop.permute.xlu1 %164 }
 0x11f   :  { %v175_v58 = vmul.f32 %v173_v53, %v172_v50  ;;  %v174_v0 = vmul.f32 %v173_v53, %v165_v51 }
 0x127   :  { %v127_v46 = vpop.f32.mrf.mxu1 }
 0x128   :  { %v153_v47 = vadd.f32 %v152_v45, %v127_v46 }
 0x12a   :  { %v176_v48 = vperm.slane %v153_v47, 0  ;;  %v183_v49 = vperm.slane %v153_v47, 1 }
 0x12c   :  { %188 = vperm.xlu0 %1233, %v183_v49   ;;  %181 = vperm.xlu1 %1234, %v176_v48  }
 0x19e   :  { %v189_v56 = vpop.permute.xlu0 %188  ;;  %v182_v57 = vpop.permute.xlu1 %181 }
 0x19f   :  { %v192_v60 = vmul.f32 %v190_v54, %v189_v56  ;;  %v191_v61 = vmul.f32 %v190_v54, %v182_v57 }
 0x1a1   :  { %v194_v62 = vadd.f32 %v192_v60, %v175_v58  ;;  %v193_v2 = vadd.f32 %v191_v61, %v174_v0 }
 0x1a3   :  { %v1492_v1 = vadd.f32 %v1235_v59, %v194_v62  ;;  %v1495_v4 = vadd.f32 %v1235_v59, %v193_v2 }
 0x1a5   :  { %v227_v3 = vadd.f32 %v223_v63, %v1492_v1  ;;  %v226_v5 = vadd.f32 %v219_v55, %v1495_v4 }
 0x1a7   :  { %1238 = vtanh.f32 %v227_v3  ;;  %v1198_v8 = vmul.f32 -1.442695, %v227_v3  ;;  %v1197_v9 = vmul.f32 -1.442695, %v226_v5 }
 0x1a8   :  { %1240 = vtanh.f32 %v226_v5 }
 0x1a9   :  { %1242 = vpow2.f32 %v1198_v8 }
 0x1aa   :  { %1244 = vpow2.f32 %v1197_v9 }
 0x1ad   :  { %v1239_v6 = vpop.eup %1238 }
 0x1ae   :  { %274 = vrot.lane.b32.xlu2 %v1239_v6, %s1451_s0  ;;  %v1241_v7 = vpop.eup %1240 }
 0x1af   :  { %v1243_v10 = vpop.eup %1242 }
 0x1b0   :  { %v235_v11 = vadd.f32 1.0, %v1243_v10  ;;  %v1245_v12 = vpop.eup %1244 }
 0x1b1   :  { %v234_v13 = vadd.f32 1.0, %v1245_v12 }
 0x1b2   :  { %1246 = vrcp.f32 %v235_v11  ;;  %v262_v22 = vand.u32 2147483648, %v235_v11  ;;  %vm256_vm2 = vweird.f32 %v235_v11  ;;  %v260_v23 = vand.u32 2147483647, %v235_v11 }
 0x1b3   :  { %1248 = vrcp.f32 %v234_v13  ;;  %v247_v31 = vand.u32 2147483648, %v234_v13  ;;  %vm241_vm6 = vweird.f32 %v234_v13  ;;  %v245_v32 = vand.u32 2147483647, %v234_v13 }
 0x1b4   :  { %v263_v26 = vor.u32 1.1754944e-38, %v262_v22  ;;  %vm261_vm4 = vcmp.eq.f32.partialorder %v260_v23, 8.507059e+37 }
 0x1b5   :  { %v248_v34 = vor.u32 1.1754944e-38, %v247_v31  ;;  %vm246_vm8 = vcmp.eq.f32.partialorder %v245_v32, 8.507059e+37 }
 0x1b6   :  { %272 = vrot.lane.b32.xlu2 %v1241_v7, %s1451_s0 }
 0x1b8   :  { %v1247_v14 = vpop.eup %1246 }
 0x1b9   :  { %v252_v15 = vmul.f32 %v1247_v14, %v235_v11  ;;  %v1249_v17 = vpop.eup %1248  ;;  %vm257_vm1 = vweird.f32 %v1247_v14 }
 0x1ba   :  { %v237_v19 = vmul.f32 %v1249_v17, %v234_v13  ;;  %vm258_vm3 = vmor %vm256_vm2, %vm257_vm1  ;;  %vm242_vm5 = vweird.f32 %v1249_v17 }
 0x1bb   :  { %v253_v16 = vsub.f32 1.0, %v252_v15  ;;  %vm243_vm7 = vmor %vm241_vm6, %vm242_vm5 }
 0x1bc   :  { %v238_v21 = vsub.f32 1.0, %v237_v19 }
 0x1bd   :  { %v254_v18 = vmul.f32 %v1247_v14, %v253_v16 }
 0x1be   :  { %v239_v25 = vmul.f32 %v1249_v17, %v238_v21 }
 0x1bf   :  { %v255_v20 = vadd.f32 %v1247_v14, %v254_v18 }
 0x1c0   :  { %v240_v30 = vadd.f32 %v1249_v17, %v239_v25 }
 0x1c1   :  { %v259_v24 = vsel %vm258_vm3, %v1247_v14, %v255_v20 }
 0x1c2   :  { %v264_v28 = vsel %vm261_vm4, %v263_v26, %v259_v24  ;;  %v244_v33 = vsel %vm243_vm7, %v1249_v17, %v240_v30 }
 0x1c3   :  { %v249_v36 = vsel %vm246_vm8, %v248_v34, %v244_v33  ;;  %v269_v38 = vmul.f32 0.0, %v264_v28 }
 0x1c4   :  { %v268_v43 = vmul.f32 0.0, %v249_v36 }
 0x208   :  { %v275_v27 = vpop.permute.xlu2 %274 }
 0x209   :  { %v279_v29 = vmul.f32 %v275_v27, %v264_v28 }
 0x20b   :  { %284 = vrot.lane.b32.xlu0 %v279_v29, %s1445_s17 }
 0x210   :  { %v273_v35 = vpop.permute.xlu2 %272 }
 0x211   :  { %v278_v37 = vmul.f32 %v273_v35, %v249_v36 }
 0x213   :  { %282 = vrot.lane.b32.xlu1 %v278_v37, %s1445_s17 }
 0x27d   :  { %v285_v41 = vpop.permute.xlu0 %284 }
 0x27e   :  { %v1502_v42 = vadd.f32 %v285_v41, %v269_v38 }
 0x280   :  { %1250 = vtanh.f32 %v1502_v42  ;;  %v380_v29 = vrot.slane %v1502_v42, 7 }
 0x285   :  { %v283_v44 = vpop.permute.xlu1 %282 }
 0x286   :  { %v1251_v45 = vpop.eup %1250  ;;  %v1505_v46 = vadd.f32 %v283_v44, %v268_v43 }
 0x287   :  { %296 = vrot.lane.b32.xlu2 %v1251_v45, %s1452_s1 }
 0x288   :  { %1252 = vtanh.f32 %v1505_v46  ;;  %v379_v31 = vrot.slane %v1505_v46, 7 }
 0x28e   :  { %v1253_v47 = vpop.eup %1252 }
 0x28f   :  { %294 = vrot.lane.b32.xlu0 %v1253_v47, %s1452_s1 }
 0x2e1   :  { %v297_v48 = vpop.permute.xlu2 %296 }
 0x2e2   :  { %v301_v49 = vmul.f32 %v297_v48, %v264_v28 }
 0x2e4   :  { %v304_v51 = vrot.slane %v301_v49, 7 }
 0x301   :  { %v295_v50 = vpop.permute.xlu0 %294 }
 0x302   :  { %v300_v52 = vmul.f32 %v295_v50, %v249_v36 }
 0x304   :  { %v306_v53 = vsel %vm305_vm9, %v304_v51, %v300_v52 }
 0x305   :  { %307 = vrot.lane.b32.xlu1 %v306_v53, %s1453_s23 }
 0x377   :  { %v308_v54 = vpop.permute.xlu1 %307 }
 0x378   :  { %1199 = vmatmul.msk.f32.vlgmr.msrb.gmra.mxu1 %vm198_vm10, %v308_v54 }
 0x379   :  { %787 = vmatpush.msrb.mxu1 %v1478_v39 }
 0x37b   :  { %788 = vmatpush.msrb.mxu1 %v1480_v40 }
 0x3f5   :  { %v328_v55 = vpop.f32.mrf.mxu1 }
 0x3f6   :  { %v332_v56 = vrot.slane %v328_v55, 7  ;;  %v336_v57 = vadd.f32 %v328_v55, %v1492_v1 }
 0x3f8   :  { %v335_v58 = vadd.f32 %v332_v56, %v1495_v4  ;;  %1254 = vtanh.f32 %v336_v57  ;;  %v1201_v0 = vmul.f32 -1.442695, %v336_v57 }
 0x3fa   :  { %1256 = vtanh.f32 %v335_v58  ;;  %v1200_v61 = vmul.f32 -1.442695, %v335_v58 }
 0x3fc   :  { %1258 = vpow2.f32 %v1200_v61 }
 0x3fe   :  { %v1255_v59 = vpop.eup %1254 }
 0x3ff   :  { %389 = vrot.lane.b32.xlu0 %v1255_v59, %s1451_s0 }
 0x400   :  { %v1257_v60 = vpop.eup %1256 }
 0x401   :  { %387 = vrot.lane.b32.xlu2 %v1257_v60, %s1451_s0 }
 0x402   :  { %v1259_v62 = vpop.eup %1258 }
 0x403   :  { %v343_v63 = vadd.f32 1.0, %v1259_v62 }
 0x405   :  { %1260 = vrcp.f32 %v343_v63  ;;  %v356_v10 = vand.u32 2147483648, %v343_v63  ;;  %vm350_vm12 = vweird.f32 %v343_v63  ;;  %v354_v11 = vand.u32 2147483647, %v343_v63 }
 0x406   :  { %1262 = vpow2.f32 %v1201_v0 }
 0x407   :  { %v357_v13 = vor.u32 1.1754944e-38, %v356_v10  ;;  %vm355_vm14 = vcmp.eq.f32.partialorder %v354_v11, 8.507059e+37 }
 0x40b   :  { %v1261_v2 = vpop.eup %1260 }
 0x40c   :  { %v346_v3 = vmul.f32 %v1261_v2, %v343_v63  ;;  %v1263_v6 = vpop.eup %1262  ;;  %vm351_vm11 = vweird.f32 %v1261_v2 }
 0x40d   :  { %v344_v7 = vadd.f32 1.0, %v1263_v6  ;;  %vm352_vm13 = vmor %vm350_vm12, %vm351_vm11 }
 0x40e   :  { %v347_v5 = vsub.f32 1.0, %v346_v3 }
 0x40f   :  { %1264 = vrcp.f32 %v344_v7  ;;  %v371_v22 = vand.u32 2147483648, %v344_v7  ;;  %vm365_vm0 = vweird.f32 %v344_v7  ;;  %v369_v23 = vand.u32 2147483647, %v344_v7 }
 0x410   :  { %v348_v8 = vmul.f32 %v1261_v2, %v347_v5 }
 0x411   :  { %v372_v25 = vor.u32 1.1754944e-38, %v371_v22  ;;  %vm370_vm2 = vcmp.eq.f32.partialorder %v369_v23, 8.507059e+37 }
 0x412   :  { %v349_v9 = vadd.f32 %v1261_v2, %v348_v8 }
 0x414   :  { %v353_v12 = vsel %vm352_vm13, %v1261_v2, %v349_v9 }
 0x415   :  { %v1265_v14 = vpop.eup %1264  ;;  %v358_v16 = vsel %vm355_vm14, %v357_v13, %v353_v12 }
 0x416   :  { %v361_v18 = vmul.f32 %v1265_v14, %v344_v7  ;;  %vm366_vm15 = vweird.f32 %v1265_v14  ;;  %v383_v34 = vmul.f32 %v379_v31, %v358_v16 }
 0x417   :  { %vm367_vm1 = vmor %vm365_vm0, %vm366_vm15 }
 0x418   :  { %v362_v19 = vsub.f32 1.0, %v361_v18 }
 0x41a   :  { %v363_v20 = vmul.f32 %v1265_v14, %v362_v19 }
 0x41c   :  { %v364_v21 = vadd.f32 %v1265_v14, %v363_v20 }
 0x41e   :  { %v368_v24 = vsel %vm367_vm1, %v1265_v14, %v364_v21 }
 0x41f   :  { %v373_v27 = vsel %vm370_vm2, %v372_v25, %v368_v24 }
 0x420   :  { %v384_v30 = vmul.f32 %v380_v29, %v373_v27 }
 0x45b   :  { %v388_v15 = vpop.permute.xlu2 %387 }
 0x45c   :  { %v393_v17 = vmul.f32 %v388_v15, %v358_v16 }
 0x45e   :  { %397 = vrot.lane.b32.xlu1 %v393_v17, %s1445_s17 }
 0x471   :  { %v390_v26 = vpop.permute.xlu0 %389 }
 0x472   :  { %v394_v28 = vmul.f32 %v390_v26, %v373_v27 }
 0x474   :  { %399 = vrot.lane.b32.xlu2 %v394_v28, %s1445_s17 }
 0x4ce   :  { %v400_v32 = vpop.permute.xlu2 %399 }
 0x4cf   :  { %v1523_v33 = vadd.f32 %v400_v32, %v384_v30 }
 0x4d0   :  { %v398_v35 = vpop.permute.xlu1 %397 }
 0x4d1   :  { %1266 = vtanh.f32 %v1523_v33  ;;  %v1526_v36 = vadd.f32 %v398_v35, %v383_v34  ;;  %v495_v28 = vrot.slane %v1523_v33, 7 }
 0x4d3   :  { %1268 = vtanh.f32 %v1526_v36  ;;  %v494_v23 = vrot.slane %v1526_v36, 7 }
 0x4d7   :  { %v1267_v37 = vpop.eup %1266 }
 0x4d8   :  { %411 = vrot.lane.b32.xlu1 %v1267_v37, %s1452_s1 }
 0x4d9   :  { %v1269_v38 = vpop.eup %1268 }
 0x4da   :  { %409 = vrot.lane.b32.xlu0 %v1269_v38, %s1452_s1 }
 0x54a   :  { %v412_v41 = vpop.permute.xlu1 %411 }
 0x54b   :  { %v416_v44 = vmul.f32 %v412_v41, %v373_v27 }
 0x54c   :  { %v410_v42 = vpop.permute.xlu0 %409 }
 0x54d   :  { %v415_v43 = vmul.f32 %v410_v42, %v358_v16 }
 0x54f   :  { %v419_v45 = vrot.slane %v415_v43, 1 }
 0x551   :  { %v420_v46 = vsel %vm305_vm9, %v416_v44, %v419_v45 }
 0x552   :  { %421 = vrot.lane.b32.xlu2 %v420_v46, %s1453_s23 }
 0x5ac   :  { %v422_v47 = vpop.permute.xlu2 %421 }
 0x5ad   :  { %1202 = vmatmul.msk.f32.vlgmr.msrb.gmra.mxu3 %vm198_vm10, %v422_v47 }
 0x5ae   :  { %903 = vmatpush.msrb.mxu3 %v1478_v39 }
 0x5b0   :  { %904 = vmatpush.msrb.mxu3 %v1480_v40 }
 0x630   :  { %v442_v48 = vpop.f32.mrf.mxu3 }
 0x631   :  { %v446_v49 = vrot.slane %v442_v48, 6  ;;  %v447_v50 = vrot.slane %v442_v48, 7 }
 0x633   :  { %v450_v51 = vadd.f32 %v446_v49, %v1495_v4  ;;  %v451_v52 = vadd.f32 %v447_v50, %v1492_v1 }
 0x635   :  { %1270 = vtanh.f32 %v450_v51  ;;  %v1203_v55 = vmul.f32 -1.442695, %v450_v51  ;;  %v1204_v56 = vmul.f32 -1.442695, %v451_v52 }
 0x636   :  { %1272 = vtanh.f32 %v451_v52 }
 0x637   :  { %1274 = vpow2.f32 %v1203_v55 }
 0x638   :  { %1276 = vpow2.f32 %v1204_v56 }
 0x63b   :  { %v1271_v53 = vpop.eup %1270 }
 0x63c   :  { %v1273_v54 = vpop.eup %1272  ;;  %502 = vrot.lane.b32.xlu0 %v1271_v53, %s1451_s0 }
 0x63d   :  { %504 = vrot.lane.b32.xlu1 %v1273_v54, %s1451_s0  ;;  %v1275_v57 = vpop.eup %1274 }
 0x63e   :  { %v1277_v58 = vpop.eup %1276  ;;  %v458_v59 = vadd.f32 1.0, %v1275_v57 }
 0x63f   :  { %v459_v60 = vadd.f32 1.0, %v1277_v58 }
 0x640   :  { %1278 = vrcp.f32 %v458_v59  ;;  %v471_v9 = vand.u32 2147483648, %v458_v59  ;;  %vm465_vm5 = vweird.f32 %v458_v59  ;;  %v469_v11 = vand.u32 2147483647, %v458_v59 }
 0x641   :  { %1280 = vrcp.f32 %v459_v60  ;;  %v486_v10 = vand.u32 2147483648, %v459_v60  ;;  %vm480_vm6 = vweird.f32 %v459_v60  ;;  %v484_v12 = vand.u32 2147483647, %v459_v60 }
 0x642   :  { %v472_v15 = vor.u32 1.1754944e-38, %v471_v9  ;;  %vm470_vm11 = vcmp.eq.f32.partialorder %v469_v11, 8.507059e+37 }
 0x643   :  { %v487_v16 = vor.u32 1.1754944e-38, %v486_v10  ;;  %vm485_vm12 = vcmp.eq.f32.partialorder %v484_v12, 8.507059e+37 }
 0x646   :  { %v1279_v61 = vpop.eup %1278 }
 0x647   :  { %v1281_v62 = vpop.eup %1280  ;;  %v461_v63 = vmul.f32 %v1279_v61, %v458_v59  ;;  %vm466_vm3 = vweird.f32 %v1279_v61 }
 0x648   :  { %v476_v0 = vmul.f32 %v1281_v62, %v459_v60  ;;  %vm481_vm4 = vweird.f32 %v1281_v62  ;;  %vm467_vm7 = vmor %vm465_vm5, %vm466_vm3 }
 0x649   :  { %v462_v2 = vsub.f32 1.0, %v461_v63  ;;  %vm482_vm8 = vmor %vm480_vm6, %vm481_vm4 }
 0x64a   :  { %v477_v3 = vsub.f32 1.0, %v476_v0 }
 0x64b   :  { %v463_v5 = vmul.f32 %v1279_v61, %v462_v2 }
 0x64c   :  { %v478_v6 = vmul.f32 %v1281_v62, %v477_v3 }
 0x64d   :  { %v464_v7 = vadd.f32 %v1279_v61, %v463_v5 }
 0x64e   :  { %v479_v8 = vadd.f32 %v1281_v62, %v478_v6 }
 0x64f   :  { %v468_v13 = vsel %vm467_vm7, %v1279_v61, %v464_v7 }
 0x650   :  { %v483_v14 = vsel %vm482_vm8, %v1281_v62, %v479_v8  ;;  %v473_v18 = vsel %vm470_vm11, %v472_v15, %v468_v13 }
 0x651   :  { %v488_v20 = vsel %vm485_vm12, %v487_v16, %v483_v14  ;;  %v498_v24 = vmul.f32 %v494_v23, %v473_v18 }
 0x652   :  { %v499_v29 = vmul.f32 %v495_v28, %v488_v20 }
 0x6ae   :  { %v503_v17 = vpop.permute.xlu0 %502 }
 0x6af   :  { %v505_v19 = vpop.permute.xlu1 %504  ;;  %v508_v21 = vmul.f32 %v503_v17, %v473_v18 }
 0x6b0   :  { %v509_v22 = vmul.f32 %v505_v19, %v488_v20 }
 0x6b1   :  { %512 = vrot.lane.b32.xlu2 %v508_v21, %s1445_s17 }
 0x6b2   :  { %514 = vrot.lane.b32.xlu0 %v509_v22, %s1445_s17 }
 0x70b   :  { %v513_v25 = vpop.permute.xlu2 %512 }
 0x70c   :  { %v1543_v26 = vadd.f32 %v513_v25, %v498_v24 }
 0x70e   :  { %1282 = vtanh.f32 %v1543_v26  ;;  %v610_v21 = vrot.slane %v1543_v26, 7 }
 0x714   :  { %v1283_v27 = vpop.eup %1282 }
 0x715   :  { %524 = vrot.lane.b32.xlu1 %v1283_v27, %s1452_s1 }
 0x724   :  { %v515_v30 = vpop.permute.xlu0 %514 }
 0x725   :  { %v1548_v31 = vadd.f32 %v515_v30, %v499_v29 }
 0x727   :  { %1284 = vtanh.f32 %v1548_v31  ;;  %v611_v16 = vrot.slane %v1548_v31, 7 }
 0x72d   :  { %v1285_v32 = vpop.eup %1284 }
 0x72e   :  { %526 = vrot.lane.b32.xlu2 %v1285_v32, %s1452_s1 }
 0x787   :  { %v525_v34 = vpop.permute.xlu1 %524 }
 0x788   :  { %v527_v35 = vpop.permute.xlu2 %526  ;;  %v530_v36 = vmul.f32 %v525_v34, %v473_v18 }
 0x789   :  { %v531_v37 = vmul.f32 %v527_v35, %v488_v20 }
 0x78a   :  { %v534_v38 = vrot.slane %v530_v36, 2 }
 0x78b   :  { %v535_v41 = vrot.slane %v531_v37, 1 }
 0x78d   :  { %v536_v42 = vsel %vm305_vm9, %v535_v41, %v534_v38 }
 0x78e   :  { %537 = vrot.lane.b32.xlu0 %v536_v42, %s1453_s23 }
 0x800   :  { %v538_v33 = vpop.permute.xlu0 %537 }
 0x801   :  { %1205 = vmatmul.msk.f32.vlgmr.msra.gmra.mxu1 %vm198_vm10, %v538_v33 }
 0x802   :  { %1019 = vmatpush.msra.mxu1 %v1478_v39 }
 0x804   :  { %1020 = vmatpush.msra.mxu1 %v1480_v40 }
 0x87e   :  { %v558_v43 = vpop.f32.mrf.mxu1 }
 0x87f   :  { %v562_v44 = vrot.slane %v558_v43, 5  ;;  %v563_v45 = vrot.slane %v558_v43, 6 }
 0x881   :  { %v566_v46 = vadd.f32 %v562_v44, %v1495_v4  ;;  %v567_v47 = vadd.f32 %v563_v45, %v1492_v1 }
 0x883   :  { %1286 = vtanh.f32 %v566_v46  ;;  %v1207_v50 = vmul.f32 -1.442695, %v567_v47  ;;  %v1206_v52 = vmul.f32 -1.442695, %v566_v46 }
 0x884   :  { %1288 = vtanh.f32 %v567_v47 }
 0x885   :  { %1290 = vpow2.f32 %v1207_v50 }
 0x889   :  { %v1287_v48 = vpop.eup %1286 }
 0x88a   :  { %v1289_v49 = vpop.eup %1288  ;;  %618 = vrot.lane.b32.xlu1 %v1287_v48, %s1451_s0 }
 0x88b   :  { %620 = vrot.lane.b32.xlu2 %v1289_v49, %s1451_s0  ;;  %v1291_v39 = vpop.eup %1290 }
 0x88c   :  { %v575_v51 = vadd.f32 1.0, %v1291_v39 }
 0x88e   :  { %1292 = vrcp.f32 %v575_v51  ;;  %v602_v59 = vand.u32 2147483648, %v575_v51  ;;  %vm596_vm14 = vweird.f32 %v575_v51  ;;  %v600_v60 = vand.u32 2147483647, %v575_v51 }
 0x88f   :  { %1294 = vpow2.f32 %v1206_v52 }
 0x890   :  { %v603_v62 = vor.u32 1.1754944e-38, %v602_v59  ;;  %vm601_vm0 = vcmp.eq.f32.partialorder %v600_v60, 8.507059e+37 }
 0x894   :  { %v1293_v40 = vpop.eup %1292 }
 0x895   :  { %v592_v53 = vmul.f32 %v1293_v40, %v575_v51  ;;  %v1295_v55 = vpop.eup %1294  ;;  %vm597_vm13 = vweird.f32 %v1293_v40 }
 0x896   :  { %v574_v57 = vadd.f32 1.0, %v1295_v55  ;;  %vm598_vm15 = vmor %vm596_vm14, %vm597_vm13 }
 0x897   :  { %v593_v54 = vsub.f32 1.0, %v592_v53 }
 0x898   :  { %1296 = vrcp.f32 %v574_v57  ;;  %v587_v9 = vand.u32 2147483648, %v574_v57  ;;  %vm581_vm2 = vweird.f32 %v574_v57  ;;  %v585_v10 = vand.u32 2147483647, %v574_v57 }
 0x899   :  { %v594_v56 = vmul.f32 %v1293_v40, %v593_v54 }
 0x89a   :  { %v588_v12 = vor.u32 1.1754944e-38, %v587_v9  ;;  %vm586_vm4 = vcmp.eq.f32.partialorder %v585_v10, 8.507059e+37 }
 0x89b   :  { %v595_v58 = vadd.f32 %v1293_v40, %v594_v56 }
 0x89d   :  { %v599_v61 = vsel %vm598_vm15, %v1293_v40, %v595_v58 }
 0x89e   :  { %v604_v0 = vsel %vm601_vm0, %v603_v62, %v599_v61  ;;  %v1297_v2 = vpop.eup %1296 }
 0x89f   :  { %v577_v5 = vmul.f32 %v1297_v2, %v574_v57  ;;  %vm582_vm1 = vweird.f32 %v1297_v2  ;;  %v615_v17 = vmul.f32 %v611_v16, %v604_v0 }
 0x8a0   :  { %vm583_vm3 = vmor %vm581_vm2, %vm582_vm1 }
 0x8a1   :  { %v578_v6 = vsub.f32 1.0, %v577_v5 }
 0x8a3   :  { %v579_v7 = vmul.f32 %v1297_v2, %v578_v6 }
 0x8a5   :  { %v580_v8 = vadd.f32 %v1297_v2, %v579_v7 }
 0x8a7   :  { %v584_v11 = vsel %vm583_vm3, %v1297_v2, %v580_v8 }
 0x8a8   :  { %v589_v14 = vsel %vm586_vm4, %v588_v12, %v584_v11 }
 0x8a9   :  { %v614_v22 = vmul.f32 %v610_v21, %v589_v14 }
 0x8e5   :  { %v621_v63 = vpop.permute.xlu2 %620 }
 0x8e6   :  { %v625_v3 = vmul.f32 %v621_v63, %v604_v0 }
 0x8e8   :  { %630 = vrot.lane.b32.xlu1 %v625_v3, %s1445_s17 }
 0x8fc   :  { %v619_v13 = vpop.permute.xlu1 %618 }
 0x8fd   :  { %v624_v15 = vmul.f32 %v619_v13, %v589_v14 }
 0x8ff   :  { %628 = vrot.lane.b32.xlu0 %v624_v15, %s1445_s17 }
 0x95a   :  { %v631_v18 = vpop.permute.xlu1 %630 }
 0x95b   :  { %v1564_v19 = vadd.f32 %v631_v18, %v615_v17 }
 0x95d   :  { %1298 = vtanh.f32 %v1564_v19  ;;  %v727_v10 = vrot.slane %v1564_v19, 7 }
 0x963   :  { %v1299_v20 = vpop.eup %1298 }
 0x964   :  { %642 = vrot.lane.b32.xlu0 %v1299_v20, %s1452_s1 }
 0x971   :  { %v629_v23 = vpop.permute.xlu0 %628 }
 0x972   :  { %v1569_v24 = vadd.f32 %v629_v23, %v614_v22 }
 0x974   :  { %1300 = vtanh.f32 %v1569_v24  ;;  %v726_v9 = vrot.slane %v1569_v24, 7 }
 0x97a   :  { %v1301_v25 = vpop.eup %1300 }
 0x97b   :  { %640 = vrot.lane.b32.xlu2 %v1301_v25, %s1452_s1 }
 0x9d5   :  { %v641_v27 = vpop.permute.xlu2 %640 }
 0x9d6   :  { %v643_v28 = vpop.permute.xlu0 %642  ;;  %v646_v29 = vmul.f32 %v641_v27, %v589_v14 }
 0x9d7   :  { %v647_v30 = vmul.f32 %v643_v28, %v604_v0 }
 0x9d8   :  { %v650_v31 = vrot.slane %v646_v29, 3 }
 0x9d9   :  { %v651_v32 = vrot.slane %v647_v30, 2 }
 0x9db   :  { %v652_v34 = vsel %vm305_vm9, %v651_v32, %v650_v31 }
 0x9dc   :  { %653 = vrot.lane.b32.xlu1 %v652_v34, %s1453_s23 }
 0xa4e   :  { %v654_v26 = vpop.permute.xlu1 %653 }
 0xa4f   :  { %1208 = vmatmul.msk.f32.vlgmr.msra.gmra.mxu3 %vm198_vm10, %v654_v26 }
 0xad2   :  { %v674_v35 = vpop.f32.mrf.mxu3 }
 0xad3   :  { %v678_v36 = vrot.slane %v674_v35, 4  ;;  %v679_v37 = vrot.slane %v674_v35, 5 }
 0xad5   :  { %v682_v38 = vadd.f32 %v678_v36, %v1495_v4  ;;  %v683_v41 = vadd.f32 %v679_v37, %v1492_v1 }
 0xad7   :  { %1302 = vtanh.f32 %v682_v38  ;;  %v1209_v43 = vmul.f32 -1.442695, %v682_v38  ;;  %v1210_v47 = vmul.f32 -1.442695, %v683_v41 }
 0xad8   :  { %1304 = vtanh.f32 %v683_v41 }
 0xad9   :  { %1306 = vpow2.f32 %v1209_v43 }
 0xadd   :  { %v1303_v42 = vpop.eup %1302 }
 0xade   :  { %v1305_v33 = vpop.eup %1304  ;;  %734 = vrot.lane.b32.xlu2 %v1303_v42, %s1451_s0 }
 0xadf   :  { %736 = vrot.lane.b32.xlu0 %v1305_v33, %s1451_s0  ;;  %v1307_v44 = vpop.eup %1306 }
 0xae0   :  { %v690_v45 = vadd.f32 1.0, %v1307_v44 }
 0xae2   :  { %1308 = vrcp.f32 %v690_v45  ;;  %v703_v52 = vand.u32 2147483648, %v690_v45  ;;  %vm697_vm6 = vweird.f32 %v690_v45  ;;  %v701_v53 = vand.u32 2147483647, %v690_v45 }
 0xae3   :  { %1310 = vpow2.f32 %v1210_v47 }
 0xae4   :  { %v704_v55 = vor.u32 1.1754944e-38, %v703_v52  ;;  %vm702_vm8 = vcmp.eq.f32.partialorder %v701_v53, 8.507059e+37 }
 0xae8   :  { %v1309_v46 = vpop.eup %1308 }
 0xae9   :  { %v693_v48 = vmul.f32 %v1309_v46, %v690_v45  ;;  %v1311_v39 = vpop.eup %1310  ;;  %vm698_vm5 = vweird.f32 %v1309_v46 }
 0xaea   :  { %v691_v51 = vadd.f32 1.0, %v1311_v39  ;;  %vm699_vm7 = vmor %vm697_vm6, %vm698_vm5 }
 0xaeb   :  { %v694_v49 = vsub.f32 1.0, %v693_v48 }
 0xaec   :  { %1312 = vrcp.f32 %v691_v51  ;;  %v718_v0 = vand.u32 2147483648, %v691_v51  ;;  %vm712_vm12 = vweird.f32 %v691_v51  ;;  %v716_v2 = vand.u32 2147483647, %v691_v51 }
 0xaed   :  { %v695_v50 = vmul.f32 %v1309_v46, %v694_v49 }
 0xaee   :  { %v719_v5 = vor.u32 1.1754944e-38, %v718_v0  ;;  %vm717_vm14 = vcmp.eq.f32.partialorder %v716_v2, 8.507059e+37 }
 0xaef   :  { %v696_v40 = vadd.f32 %v1309_v46, %v695_v50 }
 0xaf1   :  { %v700_v54 = vsel %vm699_vm7, %v1309_v46, %v696_v40 }
 0xaf2   :  { %v705_v57 = vsel %vm702_vm8, %v704_v55, %v700_v54  ;;  %v1313_v59 = vpop.eup %1312 }
 0xaf3   :  { %v708_v60 = vmul.f32 %v1313_v59, %v691_v51  ;;  %vm713_vm11 = vweird.f32 %v1313_v59  ;;  %v730_v11 = vmul.f32 %v726_v9, %v705_v57 }
 0xaf4   :  { %vm714_vm13 = vmor %vm712_vm12, %vm713_vm11 }
 0xaf5   :  { %v709_v61 = vsub.f32 1.0, %v708_v60 }
 0xaf7   :  { %v710_v62 = vmul.f32 %v1313_v59, %v709_v61 }
 0xaf9   :  { %v711_v63 = vadd.f32 %v1313_v59, %v710_v62 }
 0xafb   :  { %v715_v3 = vsel %vm714_vm13, %v1313_v59, %v711_v63 }
 0xafc   :  { %v720_v7 = vsel %vm717_vm14, %v719_v5, %v715_v3 }
 0xafd   :  { %v731_v12 = vmul.f32 %v727_v10, %v720_v7 }
 0xb38   :  { %v735_v56 = vpop.permute.xlu2 %734 }
 0xb39   :  { %v740_v58 = vmul.f32 %v735_v56, %v705_v57 }
 0xb3b   :  { %744 = vrot.lane.b32.xlu1 %v740_v58, %s1445_s17 }
 0xb51   :  { %v737_v6 = vpop.permute.xlu0 %736 }
 0xb52   :  { %v741_v8 = vmul.f32 %v737_v6, %v720_v7 }
 0xb54   :  { %746 = vrot.lane.b32.xlu2 %v741_v8, %s1445_s17 }
 0xbad   :  { %v745_v13 = vpop.permute.xlu1 %744 }
 0xbae   :  { %v747_v14 = vpop.permute.xlu2 %746  ;;  %v1584_v15 = vadd.f32 %v745_v13, %v730_v11 }
 0xbaf   :  { %v1586_v16 = vadd.f32 %v747_v14, %v731_v12 }
 0xbb0   :  { %1314 = vtanh.f32 %v1584_v15  ;;  %v842_v0 = vrot.slane %v1584_v15, 7 }
 0xbb1   :  { %1316 = vtanh.f32 %v1586_v16 }
 0xbb6   :  { %v1315_v17 = vpop.eup %1314 }
 0xbb7   :  { %v1317_v18 = vpop.eup %1316  ;;  %756 = vrot.lane.b32.xlu0 %v1315_v17, %s1452_s1 }
 0xbb8   :  { %758 = vrot.lane.b32.xlu1 %v1317_v18, %s1452_s1 }
 0xc29   :  { %v757_v20 = vpop.permute.xlu0 %756 }
 0xc2a   :  { %v759_v19 = vpop.permute.xlu1 %758  ;;  %v762_v21 = vmul.f32 %v757_v20, %v705_v57 }
 0xc2b   :  { %v763_v22 = vmul.f32 %v759_v19, %v720_v7  ;;  %v843_v7 = vrot.slane %v1586_v16, 7 }
 0xc2c   :  { %v766_v23 = vrot.slane %v762_v21, 4 }
 0xc2d   :  { %v767_v24 = vrot.slane %v763_v22, 3 }
 0xc2f   :  { %v768_v25 = vsel %vm305_vm9, %v767_v24, %v766_v23 }
 0xc30   :  { %769 = vrot.lane.b32.xlu2 %v768_v25, %s1453_s23 }
 0xc8a   :  { %v770_v27 = vpop.permute.xlu2 %769 }
 0xc8b   :  { %1211 = vmatmul.msk.f32.vlgmr.msrb.gmra.mxu1 %vm198_vm10, %v770_v27 }
 0xd08   :  { %v790_v28 = vpop.f32.mrf.mxu1 }
 0xd09   :  { %v794_v29 = vrot.slane %v790_v28, 3  ;;  %v795_v30 = vrot.slane %v790_v28, 4 }
 0xd0b   :  { %v798_v31 = vadd.f32 %v794_v29, %v1495_v4  ;;  %v799_v32 = vadd.f32 %v795_v30, %v1492_v1 }
 0xd0d   :  { %1318 = vtanh.f32 %v798_v31  ;;  %v1212_v35 = vmul.f32 -1.442695, %v798_v31  ;;  %v1213_v36 = vmul.f32 -1.442695, %v799_v32 }
 0xd0e   :  { %1320 = vtanh.f32 %v799_v32 }
 0xd0f   :  { %1322 = vpow2.f32 %v1212_v35 }
 0xd10   :  { %1324 = vpow2.f32 %v1213_v36 }
 0xd13   :  { %v1319_v34 = vpop.eup %1318 }
 0xd14   :  { %v1321_v26 = vpop.eup %1320  ;;  %850 = vrot.lane.b32.xlu0 %v1319_v34, %s1451_s0 }
 0xd15   :  { %852 = vrot.lane.b32.xlu1 %v1321_v26, %s1451_s0  ;;  %v1323_v37 = vpop.eup %1322 }
 0xd16   :  { %v1325_v38 = vpop.eup %1324  ;;  %v806_v41 = vadd.f32 1.0, %v1323_v37 }
 0xd17   :  { %v807_v42 = vadd.f32 1.0, %v1325_v38 }
 0xd18   :  { %1326 = vrcp.f32 %v806_v41  ;;  %v819_v51 = vand.u32 2147483648, %v806_v41  ;;  %vm813_vm1 = vweird.f32 %v806_v41  ;;  %v817_v52 = vand.u32 2147483647, %v806_v41 }
 0xd19   :  { %1328 = vrcp.f32 %v807_v42  ;;  %v834_v40 = vand.u32 2147483648, %v807_v42  ;;  %vm828_vm2 = vweird.f32 %v807_v42  ;;  %v832_v53 = vand.u32 2147483647, %v807_v42 }
 0xd1a   :  { %v820_v56 = vor.u32 1.1754944e-38, %v819_v51  ;;  %vm818_vm5 = vcmp.eq.f32.partialorder %v817_v52, 8.507059e+37 }
 0xd1b   :  { %v835_v57 = vor.u32 1.1754944e-38, %v834_v40  ;;  %vm833_vm6 = vcmp.eq.f32.partialorder %v832_v53, 8.507059e+37 }
 0xd1e   :  { %v1327_v33 = vpop.eup %1326 }
 0xd1f   :  { %v1329_v43 = vpop.eup %1328  ;;  %v809_v44 = vmul.f32 %v1327_v33, %v806_v41  ;;  %vm814_vm15 = vweird.f32 %v1327_v33 }
 0xd20   :  { %v824_v45 = vmul.f32 %v1329_v43, %v807_v42  ;;  %vm829_vm0 = vweird.f32 %v1329_v43  ;;  %vm815_vm3 = vmor %vm813_vm1, %vm814_vm15 }
 0xd21   :  { %v810_v46 = vsub.f32 1.0, %v809_v44  ;;  %vm830_vm4 = vmor %vm828_vm2, %vm829_vm0 }
 0xd22   :  { %v825_v47 = vsub.f32 1.0, %v824_v45 }
 0xd23   :  { %v811_v48 = vmul.f32 %v1327_v33, %v810_v46 }
 0xd24   :  { %v826_v49 = vmul.f32 %v1329_v43, %v825_v47 }
 0xd25   :  { %v812_v50 = vadd.f32 %v1327_v33, %v811_v48 }
 0xd26   :  { %v827_v39 = vadd.f32 %v1329_v43, %v826_v49 }
 0xd27   :  { %v816_v54 = vsel %vm815_vm3, %v1327_v33, %v812_v50 }
 0xd28   :  { %v831_v55 = vsel %vm830_vm4, %v1329_v43, %v827_v39  ;;  %v821_v59 = vsel %vm818_vm5, %v820_v56, %v816_v54 }
 0xd29   :  { %v836_v61 = vsel %vm833_vm6, %v835_v57, %v831_v55  ;;  %v846_v2 = vmul.f32 %v842_v0, %v821_v59 }
 0xd2a   :  { %v847_v8 = vmul.f32 %v843_v7, %v836_v61 }
 0xd86   :  { %v851_v58 = vpop.permute.xlu0 %850 }
 0xd87   :  { %v853_v60 = vpop.permute.xlu1 %852  ;;  %v856_v62 = vmul.f32 %v851_v58, %v821_v59 }
 0xd88   :  { %v857_v63 = vmul.f32 %v853_v60, %v836_v61 }
 0xd89   :  { %860 = vrot.lane.b32.xlu2 %v856_v62, %s1445_s17 }
 0xd8a   :  { %862 = vrot.lane.b32.xlu0 %v857_v63, %s1445_s17 }
 0xde3   :  { %v861_v3 = vpop.permute.xlu2 %860 }
 0xde4   :  { %v1602_v5 = vadd.f32 %v861_v3, %v846_v2 }
 0xde6   :  { %1330 = vtanh.f32 %v1602_v5  ;;  %v958_v62 = vrot.slane %v1602_v5, 7 }
 0xdec   :  { %v1331_v6 = vpop.eup %1330 }
 0xded   :  { %872 = vrot.lane.b32.xlu1 %v1331_v6, %s1452_s1 }
 0xdfc   :  { %v863_v9 = vpop.permute.xlu0 %862 }
 0xdfd   :  { %v1607_v10 = vadd.f32 %v863_v9, %v847_v8 }
 0xdff   :  { %1332 = vtanh.f32 %v1607_v10  ;;  %v959_v57 = vrot.slane %v1607_v10, 7 }
 0xe05   :  { %v1333_v11 = vpop.eup %1332 }
 0xe06   :  { %874 = vrot.lane.b32.xlu2 %v1333_v11, %s1452_s1 }
 0xe5f   :  { %v873_v12 = vpop.permute.xlu1 %872 }
 0xe60   :  { %v875_v13 = vpop.permute.xlu2 %874  ;;  %v878_v14 = vmul.f32 %v873_v12, %v821_v59 }
 0xe61   :  { %v879_v15 = vmul.f32 %v875_v13, %v836_v61 }
 0xe62   :  { %v882_v17 = vrot.slane %v878_v14, 5 }
 0xe63   :  { %v883_v18 = vrot.slane %v879_v15, 4 }
 0xe65   :  { %v884_v20 = vsel %vm305_vm9, %v883_v18, %v882_v17 }
 0xe66   :  { %885 = vrot.lane.b32.xlu0 %v884_v20, %s1453_s23 }
 0xed8   :  { %v886_v16 = vpop.permute.xlu0 %885 }
 0xed9   :  { %1214 = vmatmul.msk.f32.vlgmr.msrb.gmra.mxu3 %vm198_vm10, %v886_v16 }
 0xf5c   :  { %v906_v19 = vpop.f32.mrf.mxu3 }
 0xf5d   :  { %v910_v21 = vrot.slane %v906_v19, 2  ;;  %v911_v22 = vrot.slane %v906_v19, 3 }
 0xf5f   :  { %v914_v23 = vadd.f32 %v910_v21, %v1495_v4  ;;  %v915_v24 = vadd.f32 %v911_v22, %v1492_v1 }
 0xf61   :  { %1334 = vtanh.f32 %v914_v23  ;;  %v1216_v28 = vmul.f32 -1.442695, %v915_v24  ;;  %v1215_v32 = vmul.f32 -1.442695, %v914_v23 }
 0xf62   :  { %1336 = vtanh.f32 %v915_v24 }
 0xf63   :  { %1338 = vpow2.f32 %v1216_v28 }
 0xf67   :  { %v1335_v25 = vpop.eup %1334 }
 0xf68   :  { %v1337_v27 = vpop.eup %1336  ;;  %966 = vrot.lane.b32.xlu1 %v1335_v25, %s1451_s0 }
 0xf69   :  { %968 = vrot.lane.b32.xlu2 %v1337_v27, %s1451_s0  ;;  %v1339_v29 = vpop.eup %1338 }
 0xf6a   :  { %v923_v30 = vadd.f32 1.0, %v1339_v29 }
 0xf6c   :  { %1340 = vrcp.f32 %v923_v30  ;;  %v950_v41 = vand.u32 2147483648, %v923_v30  ;;  %vm944_vm8 = vweird.f32 %v923_v30  ;;  %v948_v42 = vand.u32 2147483647, %v923_v30 }
 0xf6d   :  { %1342 = vpow2.f32 %v1215_v32 }
 0xf6e   :  { %v951_v43 = vor.u32 1.1754944e-38, %v950_v41  ;;  %vm949_vm12 = vcmp.eq.f32.partialorder %v948_v42, 8.507059e+37 }
 0xf72   :  { %v1341_v31 = vpop.eup %1340 }
 0xf73   :  { %v940_v34 = vmul.f32 %v1341_v31, %v923_v30  ;;  %v1343_v35 = vpop.eup %1342  ;;  %vm945_vm7 = vweird.f32 %v1341_v31 }
 0xf74   :  { %v922_v37 = vadd.f32 1.0, %v1343_v35  ;;  %vm946_vm11 = vmor %vm944_vm8, %vm945_vm7 }
 0xf75   :  { %v941_v26 = vsub.f32 1.0, %v940_v34 }
 0xf76   :  { %1344 = vrcp.f32 %v922_v37  ;;  %v935_v51 = vand.u32 2147483648, %v922_v37  ;;  %vm929_vm14 = vweird.f32 %v922_v37  ;;  %v933_v40 = vand.u32 2147483647, %v922_v37 }
 0xf77   :  { %v942_v36 = vmul.f32 %v1341_v31, %v941_v26 }
 0xf78   :  { %v936_v53 = vor.u32 1.1754944e-38, %v935_v51  ;;  %vm934_vm0 = vcmp.eq.f32.partialorder %v933_v40, 8.507059e+37 }
 0xf79   :  { %v943_v38 = vadd.f32 %v1341_v31, %v942_v36 }
 0xf7b   :  { %v947_v33 = vsel %vm946_vm11, %v1341_v31, %v943_v38  ;;  %vm1152_vm11 = vcmask 261120  }
 0xf7c   :  { %v952_v45 = vsel %vm949_vm12, %v951_v43, %v947_v33  ;;  %v1345_v46 = vpop.eup %1344 }
 0xf7d   :  { %v925_v48 = vmul.f32 %v1345_v46, %v922_v37  ;;  %vm930_vm13 = vweird.f32 %v1345_v46  ;;  %v963_v58 = vmul.f32 %v959_v57, %v952_v45 }
 0xf7e   :  { %vm931_vm15 = vmor %vm929_vm14, %vm930_vm13 }
 0xf7f   :  { %v926_v49 = vsub.f32 1.0, %v925_v48 }
 0xf81   :  { %v927_v50 = vmul.f32 %v1345_v46, %v926_v49 }
 0xf83   :  { %v928_v39 = vadd.f32 %v1345_v46, %v927_v50 }
 0xf85   :  { %v932_v52 = vsel %vm931_vm15, %v1345_v46, %v928_v39 }
 0xf86   :  { %v937_v55 = vsel %vm934_vm0, %v936_v53, %v932_v52 }
 0xf87   :  { %v962_v63 = vmul.f32 %v958_v62, %v937_v55 }
 0xfc3   :  { %v969_v44 = vpop.permute.xlu2 %968 }
 0xfc4   :  { %v973_v47 = vmul.f32 %v969_v44, %v952_v45 }
 0xfc6   :  { %978 = vrot.lane.b32.xlu1 %v973_v47, %s1445_s17 }
 0xfda   :  { %v967_v54 = vpop.permute.xlu1 %966 }
 0xfdb   :  { %v972_v56 = vmul.f32 %v967_v54, %v937_v55 }
 0xfdd   :  { %976 = vrot.lane.b32.xlu0 %v972_v56, %s1445_s17 }
0x1038   :  { %v979_v59 = vpop.permute.xlu1 %978 }
0x1039   :  { %v1621_v60 = vadd.f32 %v979_v59, %v963_v58  ;;  %v1113_v58 = vld [vmem:[#allocation5 + $0x130] sm:$0xff]  ;;  %v1112_v59 = vld [vmem:[#allocation5 + $0x128] sm:$0xff] }
0x103a   :  { %1144 = vmatpush.msra.mxu3 %v1113_v58 }
0x103b   :  { %1346 = vtanh.f32 %v1621_v60  ;;  %v1075_v39 = vrot.slane %v1621_v60, 7 }
0x103c   :  { %1145 = vmatpush.msra.mxu3 %v1112_v59 }
0x1041   :  { %v1347_v61 = vpop.eup %1346 }
0x1042   :  { %990 = vrot.lane.b32.xlu0 %v1347_v61, %s1452_s1 }
0x104f   :  { %v977_v0 = vpop.permute.xlu0 %976 }
0x1050   :  { %v1626_v2 = vadd.f32 %v977_v0, %v962_v63 }
0x1052   :  { %1348 = vtanh.f32 %v1626_v2  ;;  %v1074_v50 = vrot.slane %v1626_v2, 7 }
0x1058   :  { %v1349_v3 = vpop.eup %1348 }
0x1059   :  { %988 = vrot.lane.b32.xlu2 %v1349_v3, %s1452_s1 }
0x10b3   :  { %v989_v6 = vpop.permute.xlu2 %988 }
0x10b4   :  { %v991_v7 = vpop.permute.xlu0 %990  ;;  %v994_v8 = vmul.f32 %v989_v6, %v937_v55  ;;  %v1118_v6 = vld [vmem:[#allocation5 + $0x158] sm:$0xff] }
0x10b5   :  { %v995_v9 = vmul.f32 %v991_v7, %v952_v45  ;;  %v1117_v7 = vld [vmem:[#allocation5 + $0x150] sm:$0xff]  ;;  %1168 = vmatpush.msrb.mxu0 %v1118_v6 }
0x10b6   :  { %v998_v10 = vrot.slane %v994_v8, 6 }
0x10b7   :  { %v999_v11 = vrot.slane %v995_v9, 5  ;;  %1169 = vmatpush.msrb.mxu0 %v1117_v7  ;;  %v1116_v9 = vld [vmem:[#allocation5 + $0x148] sm:$0xff] }
0x10b9   :  { %v1000_v12 = vsel %vm305_vm9, %v999_v11, %v998_v10  ;;  %1170 = vmatpush.msrb.mxu0 %v1116_v9  ;;  %v1115_v10 = vld [vmem:[#allocation5 + $0x140] sm:$0xff]  ;;  %v1236_v11 = vld [vmem:[#allocation5 + $0x138] ss:$0 sm:$0xff] }
0x10ba   :  { %1001 = vrot.lane.b32.xlu1 %v1000_v12, %s1453_s23 }
0x10bb   :  { %1171 = vmatpush.msrb.mxu0 %v1115_v10 }
0x112c   :  { %v1002_v5 = vpop.permute.xlu1 %1001 }
0x112d   :  { %1217 = vmatmul.msk.f32.vlgmr.msra.gmra.mxu1 %vm198_vm10, %v1002_v5 }
0x11aa   :  { %v1022_v13 = vpop.f32.mrf.mxu1 }
0x11ab   :  { %v1026_v14 = vrot.slane %v1022_v13, 1  ;;  %v1027_v15 = vrot.slane %v1022_v13, 2 }
0x11ad   :  { %v1030_v17 = vadd.f32 %v1026_v14, %v1495_v4  ;;  %v1031_v18 = vadd.f32 %v1027_v15, %v1492_v1  ;;  %v1237_v14 = vld [vmem:[#allocation5 + $0x160] ss:$0 sm:$0xff] }
0x11af   :  { %1350 = vtanh.f32 %v1030_v17  ;;  %v1218_v19 = vmul.f32 -1.442695, %v1030_v17  ;;  %v1219_v24 = vmul.f32 -1.442695, %v1031_v18 }
0x11b0   :  { %1352 = vtanh.f32 %v1031_v18 }
0x11b1   :  { %1354 = vpow2.f32 %v1218_v19 }
0x11b5   :  { %v1351_v20 = vpop.eup %1350 }
0x11b6   :  { %v1353_v16 = vpop.eup %1352  ;;  %1082 = vrot.lane.b32.xlu2 %v1351_v20, %s1451_s0 }
0x11b7   :  { %1084 = vrot.lane.b32.xlu0 %v1353_v16, %s1451_s0  ;;  %v1355_v21 = vpop.eup %1354 }
0x11b8   :  { %v1038_v22 = vadd.f32 1.0, %v1355_v21 }
0x11ba   :  { %1356 = vrcp.f32 %v1038_v22  ;;  %v1051_v30 = vand.u32 2147483648, %v1038_v22  ;;  %vm1045_vm2 = vweird.f32 %v1038_v22  ;;  %v1049_v31 = vand.u32 2147483647, %v1038_v22 }
0x11bb   :  { %1358 = vpow2.f32 %v1219_v24 }
0x11bc   :  { %v1052_v34 = vor.u32 1.1754944e-38, %v1051_v30  ;;  %vm1050_vm4 = vcmp.eq.f32.partialorder %v1049_v31, 8.507059e+37 }
0x11c0   :  { %v1357_v23 = vpop.eup %1356 }
0x11c1   :  { %v1041_v25 = vmul.f32 %v1357_v23, %v1038_v22  ;;  %v1359_v1 = vpop.eup %1358  ;;  %vm1046_vm1 = vweird.f32 %v1357_v23 }
0x11c2   :  { %v1039_v28 = vadd.f32 1.0, %v1359_v1  ;;  %vm1047_vm3 = vmor %vm1045_vm2, %vm1046_vm1 }
0x11c3   :  { %v1042_v4 = vsub.f32 1.0, %v1041_v25 }
0x11c4   :  { %1360 = vrcp.f32 %v1039_v28  ;;  %v1066_v43 = vand.u32 2147483648, %v1039_v28  ;;  %vm1060_vm6 = vweird.f32 %v1039_v28  ;;  %v1064_v44 = vand.u32 2147483647, %v1039_v28 }
0x11c5   :  { %v1043_v27 = vmul.f32 %v1357_v23, %v1042_v4 }
0x11c6   :  { %v1067_v46 = vor.u32 1.1754944e-38, %v1066_v43  ;;  %vm1065_vm8 = vcmp.eq.f32.partialorder %v1064_v44, 8.507059e+37 }
0x11c7   :  { %v1044_v29 = vadd.f32 %v1357_v23, %v1043_v27 }
0x11c9   :  { %v1048_v32 = vsel %vm1047_vm3, %v1357_v23, %v1044_v29 }
0x11ca   :  { %v1053_v35 = vsel %vm1050_vm4, %v1052_v34, %v1048_v32  ;;  %v1361_v37 = vpop.eup %1360 }
0x11cb   :  { %v1056_v38 = vmul.f32 %v1361_v37, %v1039_v28  ;;  %vm1061_vm5 = vweird.f32 %v1361_v37  ;;  %v1078_v51 = vmul.f32 %v1074_v50, %v1053_v35 }
0x11cc   :  { %vm1062_vm7 = vmor %vm1060_vm6, %vm1061_vm5 }
0x11cd   :  { %v1057_v41 = vsub.f32 1.0, %v1056_v38 }
0x11cf   :  { %v1058_v42 = vmul.f32 %v1361_v37, %v1057_v41 }
0x11d1   :  { %v1059_v33 = vadd.f32 %v1361_v37, %v1058_v42 }
0x11d3   :  { %v1063_v45 = vsel %vm1062_vm7, %v1361_v37, %v1059_v33 }
0x11d4   :  { %v1068_v48 = vsel %vm1065_vm8, %v1067_v46, %v1063_v45 }
0x11d5   :  { %v1079_v40 = vmul.f32 %v1075_v39, %v1068_v48 }
0x1210   :  { %v1083_v26 = vpop.permute.xlu2 %1082 }
0x1211   :  { %v1088_v36 = vmul.f32 %v1083_v26, %v1053_v35 }
0x1213   :  { %1092 = vrot.lane.b32.xlu1 %v1088_v36, %s1445_s17 }
0x1229   :  { %v1085_v47 = vpop.permute.xlu0 %1084 }
0x122a   :  { %v1089_v49 = vmul.f32 %v1085_v47, %v1068_v48 }
0x122c   :  { %1094 = vrot.lane.b32.xlu2 %v1089_v49, %s1445_s17 }
0x1285   :  { %v1093_v52 = vpop.permute.xlu1 %1092 }
0x1286   :  { %v1095_v53 = vpop.permute.xlu2 %1094  ;;  %v1098_v54 = vadd.f32 %v1093_v52, %v1078_v51 }
0x1287   :  { %v1099_v55 = vadd.f32 %v1095_v53, %v1079_v40 }
0x1288   :  { %1362 = vtanh.f32 %v1098_v54 }
0x1289   :  { %1364 = vtanh.f32 %v1099_v55 }
0x128e   :  { %v1363_v56 = vpop.eup %1362 }
0x128f   :  { %v1365_v57 = vpop.eup %1364  ;;  %1104 = vrot.lane.b32.xlu0 %v1363_v56, %s1452_s1 }
0x1290   :  { %1106 = vrot.lane.b32.xlu1 %v1365_v57, %s1452_s1 }
0x1301   :  { %v1105_v61 = vpop.permute.xlu0 %1104 }
0x1302   :  { %v1107_v60 = vpop.permute.xlu1 %1106  ;;  %v1110_v62 = vmul.f32 %v1105_v61, %v1053_v35 }
0x1303   :  { %v1111_v63 = vmul.f32 %v1107_v60, %v1068_v48 }
0x1304   :  { %v1123_v0 = vrot.slane %v1110_v62, 7 }
0x1305   :  { %v1124_v2 = vrot.slane %v1111_v63, 6 }
0x1307   :  { %v1125_v3 = vsel %vm305_vm9, %v1124_v2, %v1123_v0  ;;  %vm1176_vm9 = vcmask 25600  }
0x1308   :  { %1126 = vrot.lane.b32.xlu2 %v1125_v3, %s1453_s23 }
0x1362   :  { %v1127_v8 = vpop.permute.xlu2 %1126 }
0x1363   :  { %1220 = vmatmul.msk.f32.vlgmr.msra.gmra.mxu3 %vm198_vm10, %v1127_v8 }
0x13e6   :  { %v1147_v12 = vpop.f32.mrf.mxu3 }
0x13e7   :  { %v1148_v5 = vadd.f32 %v1236_v11, %v1147_v12 }
0x13e9   :  { %v1150_v13 = vmax.f32 %v1148_v5, 0.0 }
0x13eb   :  { %1221 = vmatmul.msk.f32.vlgmr.msrb.gmra.mxu0 %vm1152_vm11, %v1150_v13 }
0x1468   :  { %v1173_v15 = vpop.f32.mrf.mxu0 }
0x1469   :  { %v1174_v17 = vadd.f32 %v1237_v14, %v1173_v15 }
0x146b   :  { %1177 = vst.msk [vmem:[#allocation7] sm:$0x3] %vm1176_vm9, %v1174_v17 }
0x146c   :  { %1188 = dma.vmem_to_hbm [thread:$0]  %s1184_s25, 32, %s1186_s28, [#allocation4]  }
0x146d   :  { %1442 = dma.done.wait [#allocation4], 32  }
0x146e   :  { %1443 = vsyncadd [#allocation4], 4294967264 }
0x146f   :  { %1193 = vsyncpa [#allocation3], 1 }
0x1470   :  { %1194 = vsyncpa [#allocation6], 1 }
0x1471   :  { %1195 = vsyncpa [#allocation4], 1 }

</bundles_post_ra>
